<compile_context>
chip_gen: v6e
topology: v6e:2x2x1
jax: 0.10.0
libtpu: 0.0.40
codegen_flags: <defaults>
</compile_context>

<pallas_src>
import jax
import jax.numpy as jnp
from jax.experimental import pallas as pl
from jax.experimental.pallas import tpu as pltpu

EPS = 1e-5                      # torch.nn.LayerNorm default eps
_INV_SQRT2 = 0.7071067811865476
_MXU_DTYPE = jnp.bfloat16       # review-requested MXU operand dtype (f32 accum kept)


def _layernorm(x, g, b):
    # One-pass statistics (mean and mean-of-squares); f32 throughout.
    mu = jnp.mean(x, axis=-1, keepdims=True)
    ms = jnp.mean(x * x, axis=-1, keepdims=True)
    var = jnp.maximum(ms - mu * mu, 0.0)
    return (x - mu) * jax.lax.rsqrt(var + EPS) * g + b


def _gelu(x):
    # exact (erf-based) GELU, matching torch.nn.GELU() default
    return x * 0.5 * (1.0 + jax.lax.erf(x * _INV_SQRT2))


# ---------------------------------------------------------------------------
# Fused kernel: patch-embed (d==0) -> mixer block d -> head (d==last)
# ---------------------------------------------------------------------------
def _mixer_fused_kernel(
    # inputs
    patches_ref,                 # (B_TILE, N, K)  bf16, per batch tile
    pw_ref, pb_ref,              # (K, D) bf16, (1, D) f32   patch-embed (resident)
    ln1g_ref, ln1b_ref,          # (1, 1, D) f32             per-depth slices
    tw1t_ref, tb1_ref,           # (1, T, N) bf16, (1, T, 1) f32  token-mix lin1 (pre-T)
    tw2t_ref, tb2_ref,           # (1, N, T) bf16, (1, N, 1) f32  token-mix lin2 (pre-T)
    ln2g_ref, ln2b_ref,          # (1, 1, D) f32
    cw1_ref, cb1_ref,            # (1, D, C) bf16, (1, 1, C) f32  channel-mix lin1
    cw2_ref, cb2_ref,            # (1, C, D) bf16, (1, 1, D) f32  channel-mix lin2
    lng_ref, lnb_ref,            # (1, D) f32                head LayerNorm (resident)
    hw_ref, hb_ref,              # (D, NCLS) bf16, (1, NCLS) f32  head linear (resident)
    # output
    o_ref,                       # (1, B_TILE, NCLS) f32
    # scratch
    tok_ref,                     # (B_TILE, N, D) f32 VMEM, resident across depth
):
    d = pl.program_id(1)
    bt, N, D = tok_ref.shape

    # ---- patch embedding: only on the first depth step of each batch tile ----
    @pl.when(d == 0)
    def _():
        K = patches_ref.shape[-1]
        pf = patches_ref[...].reshape(bt * N, K)                     # bf16
        emb = jnp.dot(pf, pw_ref[...],
                      preferred_element_type=jnp.float32) + pb_ref[...]
        tok_ref[...] = emb.reshape(bt, N, D)

    x = tok_ref[...]                                                 # f32 (bt, N, D)

    # ---- token mixing: LN -> MLP over the patch axis (no transposes) ----
    xn = _layernorm(x, ln1g_ref[0], ln1b_ref[0]).astype(_MXU_DTYPE)  # (bt, N, D)
    w1t, w2t = tw1t_ref[0], tw2t_ref[0]                              # (T, N), (N, T) bf16
    T = w1t.shape[0]
    b1 = jnp.broadcast_to(tb1_ref[0], (T, D))                        # hoisted broadcasts
    b2 = jnp.broadcast_to(tb2_ref[0], (N, D))
    res = []
    for b in range(bt):                                              # small static bt
        hT = _gelu(jnp.dot(w1t, xn[b], preferred_element_type=jnp.float32) + b1)   # (T, D)
        r = jnp.dot(w2t, hT.astype(_MXU_DTYPE),
                    preferred_element_type=jnp.float32) + b2                        # (N, D)
        res.append(r)
    x = x + jnp.stack(res, axis=0)                                   # residual, values only

    # ---- channel mixing: LN -> MLP over channels, batch folded into M ----
    xn2 = _layernorm(x, ln2g_ref[0], ln2b_ref[0]).astype(_MXU_DTYPE) # (bt, N, D)
    xf = xn2.reshape(bt * N, D)
    h2 = _gelu(jnp.dot(xf, cw1_ref[0],
                       preferred_element_type=jnp.float32) + cb1_ref[0])
    y = jnp.dot(h2.astype(_MXU_DTYPE), cw2_ref[0],
                preferred_element_type=jnp.float32) + cb2_ref[0]
    x = x + y.reshape(bt, N, D)                                      # residual

    tok_ref[...] = x                                                 # single store/step

    # ---- head: only after the last mixer block ----
    # NOTE: output block index is constant along the depth axis, so writeback
    # happens after the last depth step; do not reorder the grid axes.
    @pl.when(d == pl.num_programs(1) - 1)
    def _():
        xh = _layernorm(x, lng_ref[...], lnb_ref[...])               # (bt, N, D)
        pooled = jnp.mean(xh, axis=1).astype(_MXU_DTYPE)             # (bt, D)
        o_ref[0] = (jnp.dot(pooled, hw_ref[...],
                            preferred_element_type=jnp.float32) + hb_ref[...])


# ---------------------------------------------------------------------------
# Topology / VMEM accounting / tile selection
# ---------------------------------------------------------------------------
def _tpu_topology():
    """Best-effort (vmem_bytes, tensorcores) detection with safe fallbacks."""
    vmem = 64 << 20          # conservative default = v7x per-TC physical VMEM
    cores = 1
    kind = ""
    try:
        kind = jax.devices()[0].device_kind.lower()
    except Exception:
        pass
    if ("v5" in kind) or ("v6" in kind):
        vmem, cores = 128 << 20, 1
    elif "v7" in kind:
        vmem, cores = 64 << 20, 2
    try:
        info = pltpu.get_tpu_info()
        v = getattr(info, "vmem_capacity_bytes", None)
        if isinstance(v, int) and v > 0:
            vmem = v
        for attr in ("num_cores", "tensorcores_per_chip", "num_tensorcores"):
            c = getattr(info, attr, None)
            if isinstance(c, int) and c > 0:
                cores = c
                break
    except Exception:
        pass
    if "v7" in kind:         # never budget above the 64 MiB per-TC physical VMEM
        vmem = min(vmem, 64 << 20)
    return vmem, cores


def _vmem_footprint(bt, N, D, K, T, C, ncls):
    """Approximate peak VMEM bytes for a given batch tile (review fix:
    counts double-buffered per-depth weight slices, resident weights, the
    patches block, tok scratch, the h2 intermediate and live activations)."""
    f32, bf16 = 4, 2
    tok = bt * N * D * f32                                   # scratch (1 copy)
    patches = 2 * bt * N * K * bf16                          # double-buffered input
    per_depth_w = 2 * ((T * N + N * T + D * C + C * D) * bf16
                       + (T + N + 2 * C + 6 * D) * f32)      # x2 double buffer
    resident_w = 2 * ((K * D + D * ncls) * bf16 + (ncls + 6 * D) * f32)
    out_blk = 2 * bt * ncls * f32
    # live activation temporaries: xn/xn2/residual stack/y (~4x token slab),
    # h2 in f32 + its bf16 cast, per-sample token-mix temporaries.
    act = bt * N * (4 * D * f32 + C * (f32 + bf16)) + bt * (T + N) * D * f32
    return tok + patches + per_depth_w + resident_w + out_blk + act


def _pick_b_tile(B, N, D, K, T, C, ncls, budget_bytes, cores):
    """Largest divisor of B whose footprint fits the budget; on multi-core
    chips prefer tiles that keep num_tiles a multiple of the core count so
    both TensorCores get balanced work.  On 1-core chips maximize b_tile."""
    def fits(t):
        return _vmem_footprint(t, N, D, K, T, C, ncls) <= budget_bytes
    divs = [t for t in range(1, B + 1) if B % t == 0]
    candidate_sets = []
    if cores > 1:
        candidate_sets.append([t for t in divs if (B // t) % cores == 0])
    candidate_sets.append(divs)
    for cand in candidate_sets:
        ok = [t for t in cand if fits(t)]
        if ok:
            return max(ok)
    return 1


def _stack_blocks(blocks):
    """Stack per-block params along a leading depth axis, in kernel layout.

    Token-mix weights/biases are stored pre-transposed so the kernel contracts
    over the patch axis with plain 2-D matmuls (no in-kernel transposes).
    Matmul weights are stored bf16 (halved DMA/VMEM); biases/LN params f32.
    """
    bf, f32 = _MXU_DTYPE, jnp.float32

    def st(f, dt):
        return jnp.stack([f(b) for b in blocks], axis=0).astype(dt)

    return dict(
        ln1_g=st(lambda b: b["ln1_g"], f32),     # (L, 1, D)
        ln1_b=st(lambda b: b["ln1_b"], f32),     # (L, 1, D)
        tw1t=st(lambda b: b["tw1"].T, bf),       # (L, T, N)
        tb1=st(lambda b: b["tb1"].T, f32),       # (L, T, 1)
        tw2t=st(lambda b: b["tw2"].T, bf),       # (L, N, T)
        tb2=st(lambda b: b["tb2"].T, f32),       # (L, N, 1)
        ln2_g=st(lambda b: b["ln2_g"], f32),     # (L, 1, D)
        ln2_b=st(lambda b: b["ln2_b"], f32),     # (L, 1, D)
        cw1=st(lambda b: b["cw1"], bf),          # (L, D, C)
        cb1=st(lambda b: b["cb1"], f32),         # (L, 1, C)
        cw2=st(lambda b: b["cw2"], bf),          # (L, C, D)
        cb2=st(lambda b: b["cb2"], f32),         # (L, 1, D)
    )


# ---------------------------------------------------------------------------
# Wrapper
# ---------------------------------------------------------------------------
def mlp_mixer_forward(x, params):
    B, C, H, W = x.shape
    p = params["patch_size"]
    D = params["dim"]
    ncls = params["num_classes"]
    depth = len(params["blocks"])
    assert depth >= 1
    hp, wp = H // p, W // p
    N = hp * wp
    K = C * p * p

    # Non-overlapping patch extraction (== Conv2d(kernel=stride=p) as a matmul):
    # (B,C,H,W) -> (B,hp,wp,C,p,p) -> (B, N, C*p*p).  Pure layout, done in XLA.
    # Cast to bf16 here: it is an MXU operand and this halves its VMEM block.
    patches = (
        x.reshape(B, C, hp, p, wp, p)
        .transpose(0, 2, 4, 1, 3, 5)
        .reshape(B, N, K)
        .astype(_MXU_DTYPE)
    )

    s = _stack_blocks(params["blocks"])
    T = s["tw1t"].shape[1]
    Cd = s["cw1"].shape[2]

    vmem_cap, cores = _tpu_topology()
    budget = int(vmem_cap * 0.7)                 # headroom for Mosaic scratch
    b_tile = _pick_b_tile(B, N, D, K, T, Cd, ncls, budget, cores)
    num_tiles = B // b_tile
    footprint = _vmem_footprint(b_tile, N, D, K, T, Cd, ncls)
    vmem_limit = int(min(vmem_cap * 0.9, max(footprint + (8 << 20), 32 << 20)))

    def resident(shape):
        nd = len(shape)
        return pl.BlockSpec(shape, lambda b, d, _nd=nd: (0,) * _nd)

    def per_depth(arr):
        # one depth slice per inner grid step; block index follows d only.
        return pl.BlockSpec((1,) + arr.shape[1:], lambda b, d: (d, 0, 0))

    in_specs = [
        pl.BlockSpec((b_tile, N, K), lambda b, d: (b, 0, 0)),   # patches
        resident((K, D)),                                        # patch_w
        resident((1, D)),                                        # patch_b
        per_depth(s["ln1_g"]), per_depth(s["ln1_b"]),
        per_depth(s["tw1t"]), per_depth(s["tb1"]),
        per_depth(s["tw2t"]), per_depth(s["tb2"]),
        per_depth(s["ln2_g"]), per_depth(s["ln2_b"]),
        per_depth(s["cw1"]), per_depth(s["cb1"]),
        per_depth(s["cw2"]), per_depth(s["cb2"]),
        resident((1, D)), resident((1, D)),                      # head LayerNorm
        resident((D, ncls)), resident((1, ncls)),                # head linear
    ]

    out = pl.pallas_call(
        _mixer_fused_kernel,
        grid=(num_tiles, depth),
        in_specs=in_specs,
        out_specs=pl.BlockSpec((1, b_tile, ncls), lambda b, d: (b, 0, 0)),
        out_shape=jax.ShapeDtypeStruct((num_tiles, b_tile, ncls), jnp.float32),
        scratch_shapes=[pltpu.VMEM((b_tile, N, D), jnp.float32)],
        compiler_params=pltpu.CompilerParams(
            dimension_semantics=("parallel", "arbitrary"),
            vmem_limit_bytes=vmem_limit,
        ),
    )(
        patches,
        params["patch_w"].astype(_MXU_DTYPE), params["patch_b"].astype(jnp.float32),
        s["ln1_g"], s["ln1_b"], s["tw1t"], s["tb1"], s["tw2t"], s["tb2"],
        s["ln2_g"], s["ln2_b"], s["cw1"], s["cb1"], s["cw2"], s["cb2"],
        params["ln_g"].astype(jnp.float32), params["ln_b"].astype(jnp.float32),
        params["head_w"].astype(_MXU_DTYPE), params["head_b"].astype(jnp.float32),
    )
    return out.reshape(B, ncls)


# ---------------------------------------------------------------------------
# Deterministic parameter initialization (synthetic weights, natural layout)
# ---------------------------------------------------------------------------
def init_params(key, in_channels, dim, num_classes, patch_size, image_size,
                depth, token_dim, channel_dim):
    assert image_size % patch_size == 0
    num_patch = (image_size // patch_size) ** 2

    def lin(k, fan_in, fan_out):
        kw, kb = jax.random.split(k)
        w = jax.random.normal(kw, (fan_in, fan_out), jnp.float32) * 0.02
        b = jax.random.normal(kb, (1, fan_out), jnp.float32) * 0.02
        return w, b  # stored as (in, out): computes x @ W + b

    keys = jax.random.split(key, depth + 2)
    # If loading real Conv2d weights, flatten the (D, C, p, p) kernel in (C,p,p)
    # order (then transpose to (K, D)) to match the patch extraction above.
    patch_w, patch_b = lin(keys[0], in_channels * patch_size * patch_size, dim)

    blocks = []
    for i in range(depth):
        kb = jax.random.split(keys[1 + i], 4)
        tw1, tb1 = lin(kb[0], num_patch, token_dim)
        tw2, tb2 = lin(kb[1], token_dim, num_patch)
        cw1, cb1 = lin(kb[2], dim, channel_dim)
        cw2, cb2 = lin(kb[3], channel_dim, dim)
        blocks.append(dict(
            ln1_g=jnp.ones((1, dim), jnp.float32),
            ln1_b=jnp.zeros((1, dim), jnp.float32),
            tw1=tw1, tb1=tb1, tw2=tw2, tb2=tb2,
            ln2_g=jnp.ones((1, dim), jnp.float32),
            ln2_b=jnp.zeros((1, dim), jnp.float32),
            cw1=cw1, cb1=cb1, cw2=cw2, cb2=cb2,
        ))

    head_w, head_b = lin(keys[1 + depth], dim, num_classes)

    return dict(
        patch_size=patch_size, dim=dim, num_classes=num_classes,
        patch_w=patch_w, patch_b=patch_b,
        blocks=blocks,
        ln_g=jnp.ones((1, dim), jnp.float32),
        ln_b=jnp.zeros((1, dim), jnp.float32),
        head_w=head_w, head_b=head_b,
    )


if __name__ == "__main__":
    # Small config: in_channels=4, dim=32, num_classes=8, patch_size=4,
    # image_size=16 (-> num_patches=16), depth=2, token_dim=16, channel_dim=64
    key = jax.random.PRNGKey(0)
    k_x, k_p = jax.random.split(key)

    B, C, IMG, P = 2, 4, 16, 4
    DIM, NCLS, DEPTH, TOK, CHAN = 32, 8, 2, 16, 64

    x = jax.random.normal(k_x, (B, C, IMG, IMG), jnp.float32)
    params = init_params(k_p, C, DIM, NCLS, P, IMG, DEPTH, TOK, CHAN)

    out = mlp_mixer_forward(x, params)
    out = jax.block_until_ready(out)
    assert out.shape == (B, NCLS) and out.dtype == jnp.float32
    print("KERNEL_OK")
</pallas_src>

<mosaic_0001>
module attributes {stable_mosaic.version = 11 : i64} {
  func.func @_mixer_fused_kernel(%arg0: i32, %arg1: i32, %arg2: memref<2x16x64xbf16, #tpu.memory_space<vmem>>, %arg3: memref<64x32xbf16, #tpu.memory_space<vmem>>, %arg4: memref<1x32xf32, #tpu.memory_space<vmem>>, %arg5: memref<1x1x32xf32, #tpu.memory_space<vmem>>, %arg6: memref<1x1x32xf32, #tpu.memory_space<vmem>>, %arg7: memref<1x16x16xbf16, #tpu.memory_space<vmem>>, %arg8: memref<1x16x1xf32, #tpu.memory_space<vmem>>, %arg9: memref<1x16x16xbf16, #tpu.memory_space<vmem>>, %arg10: memref<1x16x1xf32, #tpu.memory_space<vmem>>, %arg11: memref<1x1x32xf32, #tpu.memory_space<vmem>>, %arg12: memref<1x1x32xf32, #tpu.memory_space<vmem>>, %arg13: memref<1x32x64xbf16, #tpu.memory_space<vmem>>, %arg14: memref<1x1x64xf32, #tpu.memory_space<vmem>>, %arg15: memref<1x64x32xbf16, #tpu.memory_space<vmem>>, %arg16: memref<1x1x32xf32, #tpu.memory_space<vmem>>, %arg17: memref<1x32xf32, #tpu.memory_space<vmem>>, %arg18: memref<1x32xf32, #tpu.memory_space<vmem>>, %arg19: memref<32x8xbf16, #tpu.memory_space<vmem>>, %arg20: memref<1x8xf32, #tpu.memory_space<vmem>>, %arg21: memref<1x2x8xf32, #tpu.memory_space<vmem>>, %arg22: memref<2x16x32xf32, #tpu.memory_space<vmem>>) attributes {dimension_semantics = [#tpu.dimension_semantics<parallel>, #tpu.dimension_semantics<arbitrary>], iteration_bounds = array<i64: 1, 2>, scalar_prefetch = 0 : i64, scratch_operands = 1 : i64, tpu.core_type = #tpu.core_type<tc>, window_params = [{transform_indices = @transform_0, window_bounds = array<i64: 2, 16, 64>}, {pipeline_mode = #tpu.pipeline_mode<synchronous>, transform_indices = @transform_1, window_bounds = array<i64: 64, 32>}, {pipeline_mode = #tpu.pipeline_mode<synchronous>, transform_indices = @transform_2, window_bounds = array<i64: 1, 32>}, {transform_indices = @transform_3, window_bounds = array<i64: 1, 1, 32>}, {transform_indices = @transform_4, window_bounds = array<i64: 1, 1, 32>}, {transform_indices = @transform_5, window_bounds = array<i64: 1, 16, 16>}, {transform_indices = @transform_6, window_bounds = array<i64: 1, 16, 1>}, {transform_indices = @transform_7, window_bounds = array<i64: 1, 16, 16>}, {transform_indices = @transform_8, window_bounds = array<i64: 1, 16, 1>}, {transform_indices = @transform_9, window_bounds = array<i64: 1, 1, 32>}, {transform_indices = @transform_10, window_bounds = array<i64: 1, 1, 32>}, {transform_indices = @transform_11, window_bounds = array<i64: 1, 32, 64>}, {transform_indices = @transform_12, window_bounds = array<i64: 1, 1, 64>}, {transform_indices = @transform_13, window_bounds = array<i64: 1, 64, 32>}, {transform_indices = @transform_14, window_bounds = array<i64: 1, 1, 32>}, {pipeline_mode = #tpu.pipeline_mode<synchronous>, transform_indices = @transform_15, window_bounds = array<i64: 1, 32>}, {pipeline_mode = #tpu.pipeline_mode<synchronous>, transform_indices = @transform_16, window_bounds = array<i64: 1, 32>}, {pipeline_mode = #tpu.pipeline_mode<synchronous>, transform_indices = @transform_17, window_bounds = array<i64: 32, 8>}, {pipeline_mode = #tpu.pipeline_mode<synchronous>, transform_indices = @transform_18, window_bounds = array<i64: 1, 8>}, {transform_indices = @transform_19, window_bounds = array<i64: 1, 2, 8>}]} {
    %c0_i32 = arith.constant 0 : i32
    %0 = arith.cmpi eq, %arg1, %c0_i32 : i32
    %1 = arith.extui %0 : i1 to i32
    %c0_i32_0 = arith.constant 0 : i32
    %2 = arith.cmpi ne, %1, %c0_i32_0 : i32
    scf.if %2 {
      %c0_69 = arith.constant 0 : index
      %c0_70 = arith.constant 0 : index
      %c0_71 = arith.constant 0 : index
      %142 = vector.load %arg2[%c0_69, %c0_70, %c0_71] : memref<2x16x64xbf16, #tpu.memory_space<vmem>>, vector<2x16x64xbf16>
      %143 = vector.shape_cast %142 : vector<2x16x64xbf16> to vector<32x64xbf16>
      %c0_72 = arith.constant 0 : index
      %c0_73 = arith.constant 0 : index
      %144 = vector.load %arg3[%c0_72, %c0_73] : memref<64x32xbf16, #tpu.memory_space<vmem>>, vector<64x32xbf16>
      %cst_74 = arith.constant dense<0.000000e+00> : vector<32x32xf32>
      %145 = tpu.matmul %143, %144, %cst_74 {dimension_numbers = #tpu.dot_dimension_numbers<[1], [0], [0], [1], [0, 0, 1, 1], [], []>} : vector<32x64xbf16>, vector<64x32xbf16>, vector<32x32xf32> -> vector<32x32xf32>
      %c0_75 = arith.constant 0 : index
      %c0_76 = arith.constant 0 : index
      %146 = vector.load %arg4[%c0_75, %c0_76] : memref<1x32xf32, #tpu.memory_space<vmem>>, vector<1x32xf32>
      %147 = vector.broadcast %146 : vector<1x32xf32> to vector<32x32xf32>
      %148 = arith.addf %145, %147 : vector<32x32xf32>
      %149 = vector.shape_cast %148 : vector<32x32xf32> to vector<2x16x32xf32>
      %c0_77 = arith.constant 0 : index
      %c0_78 = arith.constant 0 : index
      %c0_79 = arith.constant 0 : index
      %150 = vector.load %arg22[%c0_77, %c0_78, %c0_79] : memref<2x16x32xf32, #tpu.memory_space<vmem>>, vector<2x16x32xf32>
      tpu.vector_store %arg22[%c0_77, %c0_78, %c0_79], %149 {strides = array<i32>} : memref<2x16x32xf32, #tpu.memory_space<vmem>>, vector<2x16x32xf32>,
    } else {
    }
    %c0 = arith.constant 0 : index
    %c0_1 = arith.constant 0 : index
    %c0_2 = arith.constant 0 : index
    %3 = vector.load %arg22[%c0, %c0_1, %c0_2] : memref<2x16x32xf32, #tpu.memory_space<vmem>>, vector<2x16x32xf32>
    %c0_3 = arith.constant 0 : index
    %c0_4 = arith.constant 0 : index
    %c0_5 = arith.constant 0 : index
    %4 = vector.load %arg5[%c0_3, %c0_4, %c0_5] : memref<1x1x32xf32, #tpu.memory_space<vmem>>, vector<1x1x32xf32>
    %5 = vector.shape_cast %4 : vector<1x1x32xf32> to vector<1x32xf32>
    %c0_6 = arith.constant 0 : index
    %c0_7 = arith.constant 0 : index
    %c0_8 = arith.constant 0 : index
    %6 = vector.load %arg6[%c0_6, %c0_7, %c0_8] : memref<1x1x32xf32, #tpu.memory_space<vmem>>, vector<1x1x32xf32>
    %7 = vector.shape_cast %6 : vector<1x1x32xf32> to vector<1x32xf32>
    %cst = arith.constant dense<0.000000e+00> : vector<2x16xf32>
    %8 = vector.multi_reduction <add>, %3, %cst [2] : vector<2x16x32xf32> to vector<2x16xf32>
    %9 = vector.shape_cast %8 : vector<2x16xf32> to vector<2x16x1xf32>
    %cst_9 = arith.constant 3.200000e+01 : f32
    %10 = vector.broadcast %cst_9 : f32 to vector<2x16x1xf32>
    %11 = arith.divf %9, %10 : vector<2x16x1xf32>
    %12 = arith.mulf %3, %3 : vector<2x16x32xf32>
    %cst_10 = arith.constant dense<0.000000e+00> : vector<2x16xf32>
    %13 = vector.multi_reduction <add>, %12, %cst_10 [2] : vector<2x16x32xf32> to vector<2x16xf32>
    %14 = vector.shape_cast %13 : vector<2x16xf32> to vector<2x16x1xf32>
    %cst_11 = arith.constant 3.200000e+01 : f32
    %15 = vector.broadcast %cst_11 : f32 to vector<2x16x1xf32>
    %16 = arith.divf %14, %15 : vector<2x16x1xf32>
    %17 = arith.mulf %11, %11 : vector<2x16x1xf32>
    %18 = arith.subf %16, %17 : vector<2x16x1xf32>
    %cst_12 = arith.constant 0.000000e+00 : f32
    %19 = vector.broadcast %cst_12 : f32 to vector<2x16x1xf32>
    %20 = arith.maximumf %18, %19 : vector<2x16x1xf32>
    %21 = vector.broadcast %11 : vector<2x16x1xf32> to vector<2x16x32xf32>
    %22 = arith.subf %3, %21 : vector<2x16x32xf32>
    %cst_13 = arith.constant 9.99999974E-6 : f32
    %23 = vector.broadcast %cst_13 : f32 to vector<2x16x1xf32>
    %24 = arith.addf %20, %23 : vector<2x16x1xf32>
    %25 = math.rsqrt %24 : vector<2x16x1xf32>
    %26 = vector.broadcast %25 : vector<2x16x1xf32> to vector<2x16x32xf32>
    %27 = arith.mulf %22, %26 : vector<2x16x32xf32>
    %28 = vector.shape_cast %5 : vector<1x32xf32> to vector<1x1x32xf32>
    %29 = vector.broadcast %28 : vector<1x1x32xf32> to vector<2x16x32xf32>
    %30 = arith.mulf %27, %29 : vector<2x16x32xf32>
    %31 = vector.shape_cast %7 : vector<1x32xf32> to vector<1x1x32xf32>
    %32 = vector.broadcast %31 : vector<1x1x32xf32> to vector<2x16x32xf32>
    %33 = arith.addf %30, %32 : vector<2x16x32xf32>
    %34 = arith.truncf %33 : vector<2x16x32xf32> to vector<2x16x32xbf16>
    %c0_14 = arith.constant 0 : index
    %c0_15 = arith.constant 0 : index
    %c0_16 = arith.constant 0 : index
    %35 = vector.load %arg7[%c0_14, %c0_15, %c0_16] : memref<1x16x16xbf16, #tpu.memory_space<vmem>>, vector<1x16x16xbf16>
    %36 = vector.shape_cast %35 : vector<1x16x16xbf16> to vector<16x16xbf16>
    %c0_17 = arith.constant 0 : index
    %c0_18 = arith.constant 0 : index
    %c0_19 = arith.constant 0 : index
    %37 = vector.load %arg9[%c0_17, %c0_18, %c0_19] : memref<1x16x16xbf16, #tpu.memory_space<vmem>>, vector<1x16x16xbf16>
    %38 = vector.shape_cast %37 : vector<1x16x16xbf16> to vector<16x16xbf16>
    %c0_20 = arith.constant 0 : index
    %c0_21 = arith.constant 0 : index
    %c0_22 = arith.constant 0 : index
    %39 = vector.load %arg8[%c0_20, %c0_21, %c0_22] : memref<1x16x1xf32, #tpu.memory_space<vmem>>, vector<1x16x1xf32>
    %40 = vector.shape_cast %39 : vector<1x16x1xf32> to vector<16x1xf32>
    %41 = vector.shape_cast %40 : vector<16x1xf32> to vector<16x1xf32>
    %42 = vector.broadcast %41 : vector<16x1xf32> to vector<16x32xf32>
    %c0_23 = arith.constant 0 : index
    %c0_24 = arith.constant 0 : index
    %c0_25 = arith.constant 0 : index
    %43 = vector.load %arg10[%c0_23, %c0_24, %c0_25] : memref<1x16x1xf32, #tpu.memory_space<vmem>>, vector<1x16x1xf32>
    %44 = vector.shape_cast %43 : vector<1x16x1xf32> to vector<16x1xf32>
    %45 = vector.shape_cast %44 : vector<16x1xf32> to vector<16x1xf32>
    %46 = vector.broadcast %45 : vector<16x1xf32> to vector<16x32xf32>
    %47 = vector.extract_strided_slice %34 {offsets = [0, 0, 0], sizes = [1, 16, 32], strides = [1, 1, 1]} : vector<2x16x32xbf16> to vector<1x16x32xbf16>
    %48 = vector.shape_cast %47 : vector<1x16x32xbf16> to vector<16x32xbf16>
    %cst_26 = arith.constant dense<0.000000e+00> : vector<16x32xf32>
    %49 = tpu.matmul %36, %48, %cst_26 {dimension_numbers = #tpu.dot_dimension_numbers<[1], [0], [0], [1], [0, 0, 1, 1], [], []>} : vector<16x16xbf16>, vector<16x32xbf16>, vector<16x32xf32> -> vector<16x32xf32>
    %50 = arith.addf %49, %42 : vector<16x32xf32>
    %cst_27 = arith.constant 5.000000e-01 : f32
    %51 = vector.broadcast %cst_27 : f32 to vector<16x32xf32>
    %52 = arith.mulf %50, %51 : vector<16x32xf32>
    %cst_28 = arith.constant 0.707106769 : f32
    %53 = vector.broadcast %cst_28 : f32 to vector<16x32xf32>
    %54 = arith.mulf %50, %53 : vector<16x32xf32>
    %55 = math.erf %54 : vector<16x32xf32>
    %cst_29 = arith.constant 1.000000e+00 : f32
    %56 = vector.broadcast %cst_29 : f32 to vector<16x32xf32>
    %57 = arith.addf %56, %55 : vector<16x32xf32>
    %58 = arith.mulf %52, %57 : vector<16x32xf32>
    %59 = arith.truncf %58 : vector<16x32xf32> to vector<16x32xbf16>
    %cst_30 = arith.constant dense<0.000000e+00> : vector<16x32xf32>
    %60 = tpu.matmul %38, %59, %cst_30 {dimension_numbers = #tpu.dot_dimension_numbers<[1], [0], [0], [1], [0, 0, 1, 1], [], []>} : vector<16x16xbf16>, vector<16x32xbf16>, vector<16x32xf32> -> vector<16x32xf32>
    %61 = arith.addf %60, %46 : vector<16x32xf32>
    %62 = vector.extract_strided_slice %34 {offsets = [1, 0, 0], sizes = [1, 16, 32], strides = [1, 1, 1]} : vector<2x16x32xbf16> to vector<1x16x32xbf16>
    %63 = vector.shape_cast %62 : vector<1x16x32xbf16> to vector<16x32xbf16>
    %cst_31 = arith.constant dense<0.000000e+00> : vector<16x32xf32>
    %64 = tpu.matmul %36, %63, %cst_31 {dimension_numbers = #tpu.dot_dimension_numbers<[1], [0], [0], [1], [0, 0, 1, 1], [], []>} : vector<16x16xbf16>, vector<16x32xbf16>, vector<16x32xf32> -> vector<16x32xf32>
    %65 = arith.addf %64, %42 : vector<16x32xf32>
    %cst_32 = arith.constant 5.000000e-01 : f32
    %66 = vector.broadcast %cst_32 : f32 to vector<16x32xf32>
    %67 = arith.mulf %65, %66 : vector<16x32xf32>
    %cst_33 = arith.constant 0.707106769 : f32
    %68 = vector.broadcast %cst_33 : f32 to vector<16x32xf32>
    %69 = arith.mulf %65, %68 : vector<16x32xf32>
    %70 = math.erf %69 : vector<16x32xf32>
    %cst_34 = arith.constant 1.000000e+00 : f32
    %71 = vector.broadcast %cst_34 : f32 to vector<16x32xf32>
    %72 = arith.addf %71, %70 : vector<16x32xf32>
    %73 = arith.mulf %67, %72 : vector<16x32xf32>
    %74 = arith.truncf %73 : vector<16x32xf32> to vector<16x32xbf16>
    %cst_35 = arith.constant dense<0.000000e+00> : vector<16x32xf32>
    %75 = tpu.matmul %38, %74, %cst_35 {dimension_numbers = #tpu.dot_dimension_numbers<[1], [0], [0], [1], [0, 0, 1, 1], [], []>} : vector<16x16xbf16>, vector<16x32xbf16>, vector<16x32xf32> -> vector<16x32xf32>
    %76 = arith.addf %75, %46 : vector<16x32xf32>
    %77 = vector.shape_cast %61 : vector<16x32xf32> to vector<1x16x32xf32>
    %78 = vector.shape_cast %76 : vector<16x32xf32> to vector<1x16x32xf32>
    %79 = tpu.concatenate %77, %78 in 0 : vector<1x16x32xf32>, vector<1x16x32xf32> -> vector<2x16x32xf32>
    %80 = arith.addf %3, %79 : vector<2x16x32xf32>
    %c0_36 = arith.constant 0 : index
    %c0_37 = arith.constant 0 : index
    %c0_38 = arith.constant 0 : index
    %81 = vector.load %arg11[%c0_36, %c0_37, %c0_38] : memref<1x1x32xf32, #tpu.memory_space<vmem>>, vector<1x1x32xf32>
    %82 = vector.shape_cast %81 : vector<1x1x32xf32> to vector<1x32xf32>
    %c0_39 = arith.constant 0 : index
    %c0_40 = arith.constant 0 : index
    %c0_41 = arith.constant 0 : index
    %83 = vector.load %arg12[%c0_39, %c0_40, %c0_41] : memref<1x1x32xf32, #tpu.memory_space<vmem>>, vector<1x1x32xf32>
    %84 = vector.shape_cast %83 : vector<1x1x32xf32> to vector<1x32xf32>
    %cst_42 = arith.constant dense<0.000000e+00> : vector<2x16xf32>
    %85 = vector.multi_reduction <add>, %80, %cst_42 [2] : vector<2x16x32xf32> to vector<2x16xf32>
    %86 = vector.shape_cast %85 : vector<2x16xf32> to vector<2x16x1xf32>
    %cst_43 = arith.constant 3.200000e+01 : f32
    %87 = vector.broadcast %cst_43 : f32 to vector<2x16x1xf32>
    %88 = arith.divf %86, %87 : vector<2x16x1xf32>
    %89 = arith.mulf %80, %80 : vector<2x16x32xf32>
    %cst_44 = arith.constant dense<0.000000e+00> : vector<2x16xf32>
    %90 = vector.multi_reduction <add>, %89, %cst_44 [2] : vector<2x16x32xf32> to vector<2x16xf32>
    %91 = vector.shape_cast %90 : vector<2x16xf32> to vector<2x16x1xf32>
    %cst_45 = arith.constant 3.200000e+01 : f32
    %92 = vector.broadcast %cst_45 : f32 to vector<2x16x1xf32>
    %93 = arith.divf %91, %92 : vector<2x16x1xf32>
    %94 = arith.mulf %88, %88 : vector<2x16x1xf32>
    %95 = arith.subf %93, %94 : vector<2x16x1xf32>
    %cst_46 = arith.constant 0.000000e+00 : f32
    %96 = vector.broadcast %cst_46 : f32 to vector<2x16x1xf32>
    %97 = arith.maximumf %95, %96 : vector<2x16x1xf32>
    %98 = vector.broadcast %88 : vector<2x16x1xf32> to vector<2x16x32xf32>
    %99 = arith.subf %80, %98 : vector<2x16x32xf32>
    %cst_47 = arith.constant 9.99999974E-6 : f32
    %100 = vector.broadcast %cst_47 : f32 to vector<2x16x1xf32>
    %101 = arith.addf %97, %100 : vector<2x16x1xf32>
    %102 = math.rsqrt %101 : vector<2x16x1xf32>
    %103 = vector.broadcast %102 : vector<2x16x1xf32> to vector<2x16x32xf32>
    %104 = arith.mulf %99, %103 : vector<2x16x32xf32>
    %105 = vector.shape_cast %82 : vector<1x32xf32> to vector<1x1x32xf32>
    %106 = vector.broadcast %105 : vector<1x1x32xf32> to vector<2x16x32xf32>
    %107 = arith.mulf %104, %106 : vector<2x16x32xf32>
    %108 = vector.shape_cast %84 : vector<1x32xf32> to vector<1x1x32xf32>
    %109 = vector.broadcast %108 : vector<1x1x32xf32> to vector<2x16x32xf32>
    %110 = arith.addf %107, %109 : vector<2x16x32xf32>
    %111 = arith.truncf %110 : vector<2x16x32xf32> to vector<2x16x32xbf16>
    %112 = vector.shape_cast %111 : vector<2x16x32xbf16> to vector<32x32xbf16>
    %c0_48 = arith.constant 0 : index
    %c0_49 = arith.constant 0 : index
    %c0_50 = arith.constant 0 : index
    %113 = vector.load %arg13[%c0_48, %c0_49, %c0_50] : memref<1x32x64xbf16, #tpu.memory_space<vmem>>, vector<1x32x64xbf16>
    %114 = vector.shape_cast %113 : vector<1x32x64xbf16> to vector<32x64xbf16>
    %cst_51 = arith.constant dense<0.000000e+00> : vector<32x64xf32>
    %115 = tpu.matmul %112, %114, %cst_51 {dimension_numbers = #tpu.dot_dimension_numbers<[1], [0], [0], [1], [0, 0, 1, 1], [], []>} : vector<32x32xbf16>, vector<32x64xbf16>, vector<32x64xf32> -> vector<32x64xf32>
    %c0_52 = arith.constant 0 : index
    %c0_53 = arith.constant 0 : index
    %c0_54 = arith.constant 0 : index
    %116 = vector.load %arg14[%c0_52, %c0_53, %c0_54] : memref<1x1x64xf32, #tpu.memory_space<vmem>>, vector<1x1x64xf32>
    %117 = vector.shape_cast %116 : vector<1x1x64xf32> to vector<1x64xf32>
    %118 = vector.broadcast %117 : vector<1x64xf32> to vector<32x64xf32>
    %119 = arith.addf %115, %118 : vector<32x64xf32>
    %cst_55 = arith.constant 5.000000e-01 : f32
    %120 = vector.broadcast %cst_55 : f32 to vector<32x64xf32>
    %121 = arith.mulf %119, %120 : vector<32x64xf32>
    %cst_56 = arith.constant 0.707106769 : f32
    %122 = vector.broadcast %cst_56 : f32 to vector<32x64xf32>
    %123 = arith.mulf %119, %122 : vector<32x64xf32>
    %124 = math.erf %123 : vector<32x64xf32>
    %cst_57 = arith.constant 1.000000e+00 : f32
    %125 = vector.broadcast %cst_57 : f32 to vector<32x64xf32>
    %126 = arith.addf %125, %124 : vector<32x64xf32>
    %127 = arith.mulf %121, %126 : vector<32x64xf32>
    %128 = arith.truncf %127 : vector<32x64xf32> to vector<32x64xbf16>
    %c0_58 = arith.constant 0 : index
    %c0_59 = arith.constant 0 : index
    %c0_60 = arith.constant 0 : index
    %129 = vector.load %arg15[%c0_58, %c0_59, %c0_60] : memref<1x64x32xbf16, #tpu.memory_space<vmem>>, vector<1x64x32xbf16>
    %130 = vector.shape_cast %129 : vector<1x64x32xbf16> to vector<64x32xbf16>
    %cst_61 = arith.constant dense<0.000000e+00> : vector<32x32xf32>
    %131 = tpu.matmul %128, %130, %cst_61 {dimension_numbers = #tpu.dot_dimension_numbers<[1], [0], [0], [1], [0, 0, 1, 1], [], []>} : vector<32x64xbf16>, vector<64x32xbf16>, vector<32x32xf32> -> vector<32x32xf32>
    %c0_62 = arith.constant 0 : index
    %c0_63 = arith.constant 0 : index
    %c0_64 = arith.constant 0 : index
    %132 = vector.load %arg16[%c0_62, %c0_63, %c0_64] : memref<1x1x32xf32, #tpu.memory_space<vmem>>, vector<1x1x32xf32>
    %133 = vector.shape_cast %132 : vector<1x1x32xf32> to vector<1x32xf32>
    %134 = vector.broadcast %133 : vector<1x32xf32> to vector<32x32xf32>
    %135 = arith.addf %131, %134 : vector<32x32xf32>
    %136 = vector.shape_cast %135 : vector<32x32xf32> to vector<2x16x32xf32>
    %137 = arith.addf %80, %136 : vector<2x16x32xf32>
    %c0_65 = arith.constant 0 : index
    %c0_66 = arith.constant 0 : index
    %c0_67 = arith.constant 0 : index
    %138 = vector.load %arg22[%c0_65, %c0_66, %c0_67] : memref<2x16x32xf32, #tpu.memory_space<vmem>>, vector<2x16x32xf32>
    tpu.vector_store %arg22[%c0_65, %c0_66, %c0_67], %137 {strides = array<i32>} : memref<2x16x32xf32, #tpu.memory_space<vmem>>, vector<2x16x32xf32>,
    %c1_i32 = arith.constant 1 : i32
    %139 = arith.cmpi eq, %arg1, %c1_i32 : i32
    %140 = arith.extui %139 : i1 to i32
    %c0_i32_68 = arith.constant 0 : i32
    %141 = arith.cmpi ne, %140, %c0_i32_68 : i32
    scf.if %141 {
      %c0_69 = arith.constant 0 : index
      %c0_70 = arith.constant 0 : index
      %142 = vector.load %arg17[%c0_69, %c0_70] : memref<1x32xf32, #tpu.memory_space<vmem>>, vector<1x32xf32>
      %c0_71 = arith.constant 0 : index
      %c0_72 = arith.constant 0 : index
      %143 = vector.load %arg18[%c0_71, %c0_72] : memref<1x32xf32, #tpu.memory_space<vmem>>, vector<1x32xf32>
      %cst_73 = arith.constant dense<0.000000e+00> : vector<2x16xf32>
      %144 = vector.multi_reduction <add>, %137, %cst_73 [2] : vector<2x16x32xf32> to vector<2x16xf32>
      %145 = vector.shape_cast %144 : vector<2x16xf32> to vector<2x16x1xf32>
      %cst_74 = arith.constant 3.200000e+01 : f32
      %146 = vector.broadcast %cst_74 : f32 to vector<2x16x1xf32>
      %147 = arith.divf %145, %146 : vector<2x16x1xf32>
      %148 = arith.mulf %137, %137 : vector<2x16x32xf32>
      %cst_75 = arith.constant dense<0.000000e+00> : vector<2x16xf32>
      %149 = vector.multi_reduction <add>, %148, %cst_75 [2] : vector<2x16x32xf32> to vector<2x16xf32>
      %150 = vector.shape_cast %149 : vector<2x16xf32> to vector<2x16x1xf32>
      %cst_76 = arith.constant 3.200000e+01 : f32
      %151 = vector.broadcast %cst_76 : f32 to vector<2x16x1xf32>
      %152 = arith.divf %150, %151 : vector<2x16x1xf32>
      %153 = arith.mulf %147, %147 : vector<2x16x1xf32>
      %154 = arith.subf %152, %153 : vector<2x16x1xf32>
      %cst_77 = arith.constant 0.000000e+00 : f32
      %155 = vector.broadcast %cst_77 : f32 to vector<2x16x1xf32>
      %156 = arith.maximumf %154, %155 : vector<2x16x1xf32>
      %157 = vector.broadcast %147 : vector<2x16x1xf32> to vector<2x16x32xf32>
      %158 = arith.subf %137, %157 : vector<2x16x32xf32>
      %cst_78 = arith.constant 9.99999974E-6 : f32
      %159 = vector.broadcast %cst_78 : f32 to vector<2x16x1xf32>
      %160 = arith.addf %156, %159 : vector<2x16x1xf32>
      %161 = math.rsqrt %160 : vector<2x16x1xf32>
      %162 = vector.broadcast %161 : vector<2x16x1xf32> to vector<2x16x32xf32>
      %163 = arith.mulf %158, %162 : vector<2x16x32xf32>
      %164 = vector.shape_cast %142 : vector<1x32xf32> to vector<1x1x32xf32>
      %165 = vector.broadcast %164 : vector<1x1x32xf32> to vector<2x16x32xf32>
      %166 = arith.mulf %163, %165 : vector<2x16x32xf32>
      %167 = vector.shape_cast %143 : vector<1x32xf32> to vector<1x1x32xf32>
      %168 = vector.broadcast %167 : vector<1x1x32xf32> to vector<2x16x32xf32>
      %169 = arith.addf %166, %168 : vector<2x16x32xf32>
      %cst_79 = arith.constant dense<0.000000e+00> : vector<2x32xf32>
      %170 = vector.multi_reduction <add>, %169, %cst_79 [1] : vector<2x16x32xf32> to vector<2x32xf32>
      %cst_80 = arith.constant 1.600000e+01 : f32
      %171 = vector.broadcast %cst_80 : f32 to vector<2x32xf32>
      %172 = arith.divf %170, %171 : vector<2x32xf32>
      %173 = arith.truncf %172 : vector<2x32xf32> to vector<2x32xbf16>
      %c0_81 = arith.constant 0 : index
      %c0_82 = arith.constant 0 : index
      %174 = vector.load %arg19[%c0_81, %c0_82] : memref<32x8xbf16, #tpu.memory_space<vmem>>, vector<32x8xbf16>
      %cst_83 = arith.constant dense<0.000000e+00> : vector<2x8xf32>
      %175 = tpu.matmul %173, %174, %cst_83 {dimension_numbers = #tpu.dot_dimension_numbers<[1], [0], [0], [1], [0, 0, 1, 1], [], []>} : vector<2x32xbf16>, vector<32x8xbf16>, vector<2x8xf32> -> vector<2x8xf32>
      %c0_84 = arith.constant 0 : index
      %c0_85 = arith.constant 0 : index
      %176 = vector.load %arg20[%c0_84, %c0_85] : memref<1x8xf32, #tpu.memory_space<vmem>>, vector<1x8xf32>
      %177 = vector.broadcast %176 : vector<1x8xf32> to vector<2x8xf32>
      %178 = arith.addf %175, %177 : vector<2x8xf32>
      %c0_86 = arith.constant 0 : index
      %c0_87 = arith.constant 0 : index
      %c0_88 = arith.constant 0 : index
      %179 = vector.load %arg21[%c0_86, %c0_87, %c0_88] : memref<1x2x8xf32, #tpu.memory_space<vmem>>, vector<1x2x8xf32>
      %180 = vector.shape_cast %179 : vector<1x2x8xf32> to vector<2x8xf32>
      %181 = vector.shape_cast %178 : vector<2x8xf32> to vector<1x2x8xf32>
      tpu.vector_store %arg21[%c0_86, %c0_87, %c0_88], %181 {strides = array<i32>} : memref<1x2x8xf32, #tpu.memory_space<vmem>>, vector<1x2x8xf32>,
    } else {
    }
    return
  }
  func.func @transform_0(%arg0: i32, %arg1: i32) -> (i32, i32, i32) {
    %c0_i32 = arith.constant 0 : i32
    %c0_i32_0 = arith.constant 0 : i32
    %c0_i32_1 = arith.constant 0 : i32
    return %arg0, %c0_i32, %c0_i32_0 : i32, i32, i32
  }
  func.func @transform_1(%arg0: i32, %arg1: i32) -> (i32, i32) {
    %c0_i32 = arith.constant 0 : i32
    %c0_i32_0 = arith.constant 0 : i32
    %c0_i32_1 = arith.constant 0 : i32
    return %c0_i32, %c0_i32_0 : i32, i32
  }
  func.func @transform_2(%arg0: i32, %arg1: i32) -> (i32, i32) {
    %c0_i32 = arith.constant 0 : i32
    %c0_i32_0 = arith.constant 0 : i32
    %c0_i32_1 = arith.constant 0 : i32
    return %c0_i32, %c0_i32_0 : i32, i32
  }
  func.func @transform_3(%arg0: i32, %arg1: i32) -> (i32, i32, i32) {
    %c0_i32 = arith.constant 0 : i32
    %c0_i32_0 = arith.constant 0 : i32
    %c0_i32_1 = arith.constant 0 : i32
    return %arg1, %c0_i32, %c0_i32_0 : i32, i32, i32
  }
  func.func @transform_4(%arg0: i32, %arg1: i32) -> (i32, i32, i32) {
    %c0_i32 = arith.constant 0 : i32
    %c0_i32_0 = arith.constant 0 : i32
    %c0_i32_1 = arith.constant 0 : i32
    return %arg1, %c0_i32, %c0_i32_0 : i32, i32, i32
  }
  func.func @transform_5(%arg0: i32, %arg1: i32) -> (i32, i32, i32) {
    %c0_i32 = arith.constant 0 : i32
    %c0_i32_0 = arith.constant 0 : i32
    %c0_i32_1 = arith.constant 0 : i32
    return %arg1, %c0_i32, %c0_i32_0 : i32, i32, i32
  }
  func.func @transform_6(%arg0: i32, %arg1: i32) -> (i32, i32, i32) {
    %c0_i32 = arith.constant 0 : i32
    %c0_i32_0 = arith.constant 0 : i32
    %c0_i32_1 = arith.constant 0 : i32
    return %arg1, %c0_i32, %c0_i32_0 : i32, i32, i32
  }
  func.func @transform_7(%arg0: i32, %arg1: i32) -> (i32, i32, i32) {
    %c0_i32 = arith.constant 0 : i32
    %c0_i32_0 = arith.constant 0 : i32
    %c0_i32_1 = arith.constant 0 : i32
    return %arg1, %c0_i32, %c0_i32_0 : i32, i32, i32
  }
  func.func @transform_8(%arg0: i32, %arg1: i32) -> (i32, i32, i32) {
    %c0_i32 = arith.constant 0 : i32
    %c0_i32_0 = arith.constant 0 : i32
    %c0_i32_1 = arith.constant 0 : i32
    return %arg1, %c0_i32, %c0_i32_0 : i32, i32, i32
  }
  func.func @transform_9(%arg0: i32, %arg1: i32) -> (i32, i32, i32) {
    %c0_i32 = arith.constant 0 : i32
    %c0_i32_0 = arith.constant 0 : i32
    %c0_i32_1 = arith.constant 0 : i32
    return %arg1, %c0_i32, %c0_i32_0 : i32, i32, i32
  }
  func.func @transform_10(%arg0: i32, %arg1: i32) -> (i32, i32, i32) {
    %c0_i32 = arith.constant 0 : i32
    %c0_i32_0 = arith.constant 0 : i32
    %c0_i32_1 = arith.constant 0 : i32
    return %arg1, %c0_i32, %c0_i32_0 : i32, i32, i32
  }
  func.func @transform_11(%arg0: i32, %arg1: i32) -> (i32, i32, i32) {
    %c0_i32 = arith.constant 0 : i32
    %c0_i32_0 = arith.constant 0 : i32
    %c0_i32_1 = arith.constant 0 : i32
    return %arg1, %c0_i32, %c0_i32_0 : i32, i32, i32
  }
  func.func @transform_12(%arg0: i32, %arg1: i32) -> (i32, i32, i32) {
    %c0_i32 = arith.constant 0 : i32
    %c0_i32_0 = arith.constant 0 : i32
    %c0_i32_1 = arith.constant 0 : i32
    return %arg1, %c0_i32, %c0_i32_0 : i32, i32, i32
  }
  func.func @transform_13(%arg0: i32, %arg1: i32) -> (i32, i32, i32) {
    %c0_i32 = arith.constant 0 : i32
    %c0_i32_0 = arith.constant 0 : i32
    %c0_i32_1 = arith.constant 0 : i32
    return %arg1, %c0_i32, %c0_i32_0 : i32, i32, i32
  }
  func.func @transform_14(%arg0: i32, %arg1: i32) -> (i32, i32, i32) {
    %c0_i32 = arith.constant 0 : i32
    %c0_i32_0 = arith.constant 0 : i32
    %c0_i32_1 = arith.constant 0 : i32
    return %arg1, %c0_i32, %c0_i32_0 : i32, i32, i32
  }
  func.func @transform_15(%arg0: i32, %arg1: i32) -> (i32, i32) {
    %c0_i32 = arith.constant 0 : i32
    %c0_i32_0 = arith.constant 0 : i32
    %c0_i32_1 = arith.constant 0 : i32
    return %c0_i32, %c0_i32_0 : i32, i32
  }
  func.func @transform_16(%arg0: i32, %arg1: i32) -> (i32, i32) {
    %c0_i32 = arith.constant 0 : i32
    %c0_i32_0 = arith.constant 0 : i32
    %c0_i32_1 = arith.constant 0 : i32
    return %c0_i32, %c0_i32_0 : i32, i32
  }
  func.func @transform_17(%arg0: i32, %arg1: i32) -> (i32, i32) {
    %c0_i32 = arith.constant 0 : i32
    %c0_i32_0 = arith.constant 0 : i32
    %c0_i32_1 = arith.constant 0 : i32
    return %c0_i32, %c0_i32_0 : i32, i32
  }
  func.func @transform_18(%arg0: i32, %arg1: i32) -> (i32, i32) {
    %c0_i32 = arith.constant 0 : i32
    %c0_i32_0 = arith.constant 0 : i32
    %c0_i32_1 = arith.constant 0 : i32
    return %c0_i32, %c0_i32_0 : i32, i32
  }
  func.func @transform_19(%arg0: i32, %arg1: i32) -> (i32, i32, i32) {
    %c0_i32 = arith.constant 0 : i32
    %c0_i32_0 = arith.constant 0 : i32
    %c0_i32_1 = arith.constant 0 : i32
    return %arg0, %c0_i32, %c0_i32_0 : i32, i32, i32
  }
}

</mosaic_0001>

<bundles_post_ra>
// kernel: tpu_custom_call.1
= control target key start
LH: loop header
LB: loop body
LE: loop exit
PB: predicated region body
PF: predicated region fallthrough
CT: control target
= control target key end

     0   :  { %s2662_s0 = inlined_call_operand.vmem [shape: bf16[2,16,64], index: 0, kind: input, shape index: {}]   ;;  %s2663_s1 = inlined_call_operand.vmem [shape: bf16[64,32], index: 1, kind: input, shape index: {}]   ;;  %s2664_s2 = inlined_call_operand.vmem [shape: f32[1,32], index: 2, kind: input, shape index: {}]   ;;  %s2665_s3 = inlined_call_operand.vmem [shape: f32[2,1,32], index: 3, kind: input, shape index: {}]   ;;  %s2666_s4 = inlined_call_operand.vmem [shape: f32[2,1,32], index: 4, kind: input, shape index: {}]   ;;  %s2667_s5 = inlined_call_operand.vmem [shape: bf16[2,16,16], index: 5, kind: input, shape index: {}]   ;;  %s2668_s6 = inlined_call_operand.vmem [shape: f32[2,16,1], index: 6, kind: input, shape index: {}]   ;;  %s2669_s7 = inlined_call_operand.vmem [shape: bf16[2,16,16], index: 7, kind: input, shape index: {}]   ;;  %s2670_s8 = inlined_call_operand.vmem [shape: f32[2,16,1], index: 8, kind: input, shape index: {}]   ;;  %s2671_s9 = inlined_call_operand.vmem [shape: f32[2,1,32], index: 9, kind: input, shape index: {}]   ;;  %s2672_s10 = inlined_call_operand.vmem [shape: f32[2,1,32], index: 10, kind: input, shape index: {}]   ;;  %s2673_s11 = inlined_call_operand.vmem [shape: bf16[2,32,64], index: 11, kind: input, shape index: {}]   ;;  %s2674_s12 = inlined_call_operand.vmem [shape: f32[2,1,64], index: 12, kind: input, shape index: {}]   ;;  %s2675_s13 = inlined_call_operand.vmem [shape: bf16[2,64,32], index: 13, kind: input, shape index: {}]   ;;  %s2676_s14 = inlined_call_operand.vmem [shape: f32[2,1,32], index: 14, kind: input, shape index: {}]   ;;  %s2677_s15 = inlined_call_operand.vmem [shape: f32[1,32], index: 15, kind: input, shape index: {}]   ;;  %s2678_s16 = inlined_call_operand.vmem [shape: f32[1,32], index: 16, kind: input, shape index: {}]   ;;  %s2679_s17 = inlined_call_operand.vmem [shape: bf16[32,8], index: 17, kind: input, shape index: {}]   ;;  %s2680_s18 = inlined_call_operand.vmem [shape: f32[1,8], index: 18, kind: input, shape index: {}]   ;;  %s2681_s19 = inlined_call_operand.hbm [shape: f32[1,2,8], index: 19, kind: output, shape index: {}]  }
   0x1   :  { %2686 = sst [smem:[#allocation9_spill]] %s2662_s0 }
   0x2   :  { %2687 = sst [smem:[#allocation10_spill]] %s2663_s1 }
   0x3   :  { %2688 = sst [smem:[#allocation11_spill]] %s2664_s2 }
   0x4   :  { %2689 = sst [smem:[#allocation12_spill]] %s2665_s3 }
   0x5   :  { %2690 = sst [smem:[#allocation13_spill]] %s2667_s5 }
   0x6   :  { %2691 = sst [smem:[#allocation14_spill]] %s2668_s6 }
   0x7   :  { %2692 = sst [smem:[#allocation15_spill]] %s2669_s7 }
   0x8   :  { %2693 = sst [smem:[#allocation16_spill]] %s2670_s8 }
   0x9   :  { %2694 = sst [smem:[#allocation17_spill]] %s2677_s15 }
   0xa   :  { %2695 = sst [smem:[#allocation18_spill]] %s2678_s16 }
   0xb   :  { %2696 = sst [smem:[#allocation19_spill]] %s2680_s18 }
   0xc   :  { %2697 = sst [smem:[#allocation20_spill]] %s2681_s19 }
   0xd   :  { %24 = vsyncpa [#allocation4], 0  ;;  %s2339_s0 = smov 0   ;;  %s2341_s30 = smov 0  }
   0xe   :  { %s2343_s20 = smov 0  }
   0xf LB: > { %2698 = sst [smem:[#allocation6_spill]] %s2227_s30  ;;  %s39_s1 = sadd.s32 1, %s2227_s30  ;;  %s2231_s20 = sphi %s2343_s20, %s30_s20   ;;  %s2227_s30 = sphi %s2341_s30, %s2722_s30   ;;  %s2223_s0 = sphi %s2339_s0, %s2721_s0  }
  0x10   : > { %2699 = sst [smem:[#allocation7_spill]] %s2231_s20  ;;  %p40_p0 = scmp.ge.s32.totalorder %s39_s1, 2 }
  0x11   : > { %p1934_p1 = scmp.ge.s32.totalorder %s2231_s20, 1  ;;  %p660_p2 = scmp.lt.s32.totalorder %s2231_s20, 3 }
  0x12   : > { %s2724_s1 = smov (%p40_p0, %s39_s1), 0 }
  0x13   : > { %2700 = sst [smem:[#allocation8_spill]] %s2724_s1  ;;  %p661_p3 = pnand %p1934_p1, %p660_p2 }
  0x14   : > { %p767_p4 = scmp.lt.s32.totalorder (!%p661_p3), %s2223_s0, 1  ;;  %s2702_s5 = sld [smem:[#allocation13_spill]] (!%p661_p3) }
  0x15   : > { %664 = sbr.rel (%p661_p3) target bundleno = 1906 (0x772), region = 96  ;;  %s2703_s6 = sld [smem:[#allocation14_spill]] (!%p661_p3) }
  0x16   : > { %s2704_s7 = sld [smem:[#allocation15_spill]] (!%p661_p3)  ;;  %p1947_p5 = scmp.ne.s32.totalorder (!%p661_p3), %s2223_s0, 0 }
  0x17   : > { %s2705_s8 = sld [smem:[#allocation16_spill]] (!%p661_p3) }
  0x1a   : > { %s2362_s22 = scalar_select %p767_p4, %s2223_s0, 1 }
  0x1b   : > { %s2707_s3 = sld [smem:[#allocation9_spill]] (!%p1947_p5) }
  0x1c   : > { %s1990_s28 = sshll.u32 %s2362_s22, 3  ;;  %s1991_s29 = sshll.u32 %s2362_s22, 4 }
  0x1d   : > { %s2377_s30 = scalar_lea.vmem %s2702_s5, %s1990_s28  ;;  %s2382_s19 = scalar_lea.vmem %s2703_s6, %s1991_s29 }
  0x1e   : > { %s2387_s24 = scalar_lea.vmem %s2704_s7, %s1990_s28  ;;  %s2392_s26 = scalar_lea.vmem %s2705_s8, %s1991_s29 }
  0x1f   : > { %s798_s2 = scalar_lea.vmem %s2672_s10, %s2362_s22  ;;  %s2405_s15 = scalar_lea.vmem %s2673_s11, %s1991_s29 }
  0x20   : > { %s806_s28 = scalar_lea.vmem %s2674_s12, %s2362_s22  ;;  %s1995_s25 = sshll.u32 %s2362_s22, 5 }
  0x21   : > { %s814_s8 = scalar_lea.vmem %s2676_s14, %s2362_s22  ;;  %s2419_s21 = scalar_lea.vmem %s2675_s13, %s1995_s25 }
  0x22   : > { %819 = sbr.rel (%p1947_p5) target bundleno = 259 (0x103), region = 100  ;;  %s2706_s29 = sld [smem:[#allocation10_spill]] (!%p1947_p5) }
  0x23   : > { %s2708_s7 = sld [smem:[#allocation11_spill]] (!%p1947_p5) }
  0x27   : > { %vm873_vm0 = vcmask 523264   ;;  %v2127_v3 = vld [vmem:[%s2707_s3] sm:$0xff]   ;;  %v2128_v5 = vld [vmem:[%s2707_s3 + $0x8] sm:$0xff]   ;;  %vm929_vm1 = vcmask 261120  }
  0x28   : > { %v2123_v0 = vld [vmem:[%s2706_s29 + $0x18] sm:$0xff]   ;;  %v2124_v1 = vld [vmem:[%s2706_s29 + $0x10] sm:$0xff]   ;;  %v2125_v2 = vld [vmem:[%s2706_s29 + $0x8] sm:$0xff]   ;;  %2031 = vmatprep.mubr.msk.bf16.mxu0 %vm873_vm0, %v2127_v3 }
  0x29   : > { %2023 = vmatprep.subr.bf16.mxu0 %v2123_v0  ;;  %v2126_v4 = vld [vmem:[%s2706_s29] sm:$0xff]  }
  0x2a   : > { %2024 = vmatpush3.bf16.msra.mxu0 %v2123_v0  ;;  %v1948_v6 = vld [vmem:[%s2708_s7] ss:$0 sm:$0xff] }
  0x2b   : > { %2025 = vmatprep.subr.bf16.mxu0 %v2124_v1 }
  0x2e   : > { %2026 = vmatpush3.bf16.msra.mxu0 %v2124_v1 }
  0x2f   : > { %2027 = vmatprep.subr.bf16.mxu0 %v2125_v2 }
  0x32   : > { %2028 = vmatpush3.bf16.msra.mxu0 %v2125_v2 }
  0x33   : > { %2029 = vmatprep.subr.bf16.mxu0 %v2126_v4 }
  0x36   : > { %2030 = vmatpush3.bf16.msra.mxu0 %v2126_v4 }
  0x39   : > { %2032 = vmatmul.mubr.msk.bf16.vlgmr.msra.gmra.mxu0 %vm873_vm0, %v2128_v5 }
  0xf9   : > { %v2033_v7 = vpop.f32.mrf.mxu0 }
  0xfa   : > { %v923_v8 = vadd.f32 %v2033_v7, %v1948_v6 }
  0xfb   : > { %v914_v9 = vpop.f32.mrf.mxu0 }
  0xfc   : > { %932 = vst.msk [vmem:[#allocation2 + $0x10] sm:$0xff] %vm929_vm1, %v923_v8  ;;  %v915_v10 = vadd.f32 %v1948_v6, %v914_v9 }
  0xfd   : > { %v2034_v11 = vpop.f32.mrf.mxu0 }
  0xfe   : > { %930 = vst.msk [vmem:[#allocation2] sm:$0xff] %vm929_vm1, %v915_v10  ;;  %v926_v12 = vadd.f32 %v2034_v11, %v1948_v6 }
  0xff   : > { %v917_v13 = vpop.f32.mrf.mxu0 }
 0x100   : > { %933 = vst.msk [vmem:[#allocation2 + $0x18] sm:$0xff] %vm929_vm1, %v926_v12  ;;  %v918_v14 = vadd.f32 %v1948_v6, %v917_v13 }
 0x102   : > { %931 = vst.msk [vmem:[#allocation2 + $0x8] sm:$0xff] %vm929_vm1, %v918_v14 }
 0x103 PF: > { %vm940_vm2 = vcmask 261120   ;;  %v2453_v20 = vld [vmem:[#allocation2 + $0x10] sm:$0xff]  ;;  %v2233_v31 = vmov 0.0   ;;  %vm2234_vm3 = vmmov 0   ;;  %v1033_v32 = vld [vmem:[%s2382_s19 + $0x8] sm:$0xff]  ;;  %v1032_v33 = vld [vmem:[%s2382_s19] sm:$0xff]  ;;  %s2711_s27 = scalar_lea.vmem %s2666_s4, %s2362_s22 }
 0x104   : > { %v947_v24 = vsel %vm940_vm2, %v2453_v20, 0.0  ;;  %v960_v26 = vmul.f32 %v2453_v20, %v2453_v20  ;;  %2035 = vmatprep.subr.bf16.mxu0 %v2233_v31  ;;  %2041 = vmatprep.subr.bf16.mxu1 %v2233_v31  ;;  %v2235_v34 = vmov 0   ;;  %v1044_v35 = vld [vmem:[%s2392_s26] sm:$0xff]  ;;  %v1045_v36 = vld [vmem:[%s2392_s26 + $0x8] sm:$0xff]  ;;  %s2709_s18 = sld [smem:[#allocation12_spill]]  ;;  %vm1061_vm4 = vcmask 130048  }
 0x105   : > { %v2443_v15 = vld [vmem:[#allocation2] sm:$0xff]  ;;  %2037 = vmatprep.mubr.msk.bf16.mxu0 %vm2234_vm3, %v2233_v31  ;;  %2043 = vmatprep.mubr.msk.bf16.mxu1 %vm2234_vm3, %v2233_v31  ;;  %vm1490_vm5 = vcmask 523264   ;;  %p1979_p6 = scmp.ne.s32.totalorder %s2223_s0, 1 }
 0x106   : > { %v941_v17 = vsel %vm940_vm2, %v2443_v15, 0.0  ;;  %v958_v18 = vmul.f32 %v2443_v15, %v2443_v15  ;;  %v968_v29 = vsel %vm940_vm2, %v960_v26, 0.0  ;;  %2130 = vset.pattern.permute.xlu1 %v2235_v34  ;;  %2129 = vset.pattern.permute.xlu0 %v2235_v34  ;;  %v1958_v13 = vld [vmem:[%s2711_s27] ss:$0 sm:$0xff]  ;;  %s2713_s26 = sld [smem:[#allocation17_spill]] (!%p1979_p6) }
 0x107   : > { %942 = vadd.xlane.f32.xlu0 %v941_v17  ;;  %v2461_v25 = vld [vmem:[#allocation2 + $0x18] sm:$0xff]  ;;  %s2714_s25 = sld [smem:[#allocation18_spill]] (!%p1979_p6) }
 0x108   : > { %v962_v21 = vsel %vm940_vm2, %v958_v18, 0.0  ;;  %v950_v27 = vsel %vm940_vm2, %v2461_v25, 0.0  ;;  %v961_v28 = vmul.f32 %v2461_v25, %v2461_v25 }
 0x109   : > { %v2445_v16 = vld [vmem:[#allocation2 + $0x8] sm:$0xff]  ;;  %963 = vadd.xlane.f32.xlu1 %v962_v21 }
 0x10a   : > { %v959_v19 = vmul.f32 %v2445_v16, %v2445_v16  ;;  %v944_v22 = vsel %vm940_vm2, %v2445_v16, 0.0  ;;  %v971_v30 = vsel %vm940_vm2, %v961_v28, 0.0  ;;  %s2710_s20 = scalar_lea.vmem %s2709_s18, %s2362_s22 }
 0x10b   : > { %945 = vadd.xlane.f32.xlu0 %v944_v22  ;;  %v1957_v8 = vld [vmem:[%s2710_s20] ss:$0 sm:$0xff] }
 0x10c   : > { %v965_v23 = vsel %vm940_vm2, %v959_v19, 0.0 }
 0x10d   : > { %966 = vadd.xlane.f32.xlu1 %v965_v23 }
 0x10f   : > { %948 = vadd.xlane.f32.xlu0 %v947_v24 }
 0x111   : > { %951 = vadd.xlane.f32.xlu1 %v950_v27  ;;  %v2131_v27 = vld [vmem:[%s2377_s30] sm:$0xff]  }
 0x113   : > { %969 = vadd.xlane.f32.xlu0 %v968_v29 }
 0x115   : > { %972 = vadd.xlane.f32.xlu1 %v971_v30 }
 0x126   : > { %1041 = vperm.xlu1 %2130, %v1033_v32  }
 0x129   : > { %1036 = vperm.xlu0 %2129, %v1032_v33  }
 0x12a   : > { %1048 = vperm.xlu1 %2130, %v1044_v35  }
 0x12e   : > { %1053 = vperm.xlu1 %2130, %v1045_v36  }
 0x190   : > { %v943_v37 = vpop.xlane.xlu0 %942 }
 0x191   : > { %v954_v38 = vmul.f32 0.03125, %v943_v37 }
 0x192   : > { %v964_v39 = vpop.xlane.xlu1 %963 }
 0x193   : > { %v978_v40 = vmul.f32 %v954_v38, %v954_v38  ;;  %v974_v41 = vmul.f32 0.03125, %v964_v39  ;;  %v990_v5 = vsub.f32 %v2443_v15, %v954_v38 }
 0x194   : > { %v946_v42 = vpop.xlane.xlu0 %945 }
 0x195   : > { %v982_v43 = vsub.f32 %v974_v41, %v978_v40  ;;  %v955_v44 = vmul.f32 0.03125, %v946_v42 }
 0x196   : > { %v967_v45 = vpop.xlane.xlu1 %966 }
 0x197   : > { %v986_v46 = vmax.f32 %v982_v43, 0.0  ;;  %v979_v47 = vmul.f32 %v955_v44, %v955_v44  ;;  %v975_v48 = vmul.f32 0.03125, %v967_v45  ;;  %v991_v9 = vsub.f32 %v2445_v16, %v955_v44 }
 0x198   : > { %v949_v49 = vpop.xlane.xlu0 %948 }
 0x199   : > { %v994_v50 = vadd.f32 1e-05, %v986_v46  ;;  %v983_v51 = vsub.f32 %v975_v48, %v979_v47  ;;  %v956_v52 = vmul.f32 0.03125, %v949_v49 }
 0x19a   : > { %v952_v53 = vpop.xlane.xlu1 %951 }
 0x19b   : > { %2139 = vrsqrt.f32 %v994_v50  ;;  %v987_v54 = vmax.f32 %v983_v51, 0.0  ;;  %v980_v55 = vmul.f32 %v956_v52, %v956_v52  ;;  %v957_v56 = vmul.f32 0.03125, %v952_v53 }
 0x19c   : > { %v970_v57 = vpop.xlane.xlu0 %969  ;;  %v992_v17 = vsub.f32 %v2453_v20, %v956_v52 }
 0x19d   : > { %v995_v58 = vadd.f32 1e-05, %v987_v54  ;;  %v976_v59 = vmul.f32 0.03125, %v970_v57  ;;  %v981_v60 = vmul.f32 %v957_v56, %v957_v56  ;;  %v993_v22 = vsub.f32 %v2461_v25, %v957_v56 }
 0x19e   : > { %v973_v61 = vpop.xlane.xlu1 %972 }
 0x19f   : > { %2141 = vrsqrt.f32 %v995_v58  ;;  %v984_v62 = vsub.f32 %v976_v59, %v980_v55  ;;  %v977_v63 = vmul.f32 0.03125, %v973_v61 }
 0x1a1   : > { %v988_v0 = vmax.f32 %v984_v62, 0.0  ;;  %v985_v1 = vsub.f32 %v977_v63, %v981_v60  ;;  %v2132_v63 = vld [vmem:[%s2387_s24] sm:$0xff]   ;;  %s2712_s24 = scalar_lea.vmem %s2671_s9, %s2362_s22 }
 0x1a2   : > { %v1042_v40 = vpop.permute.xlu1 %1041 }
 0x1a3   : > { %v996_v2 = vadd.f32 1e-05, %v988_v0  ;;  %v989_v3 = vmax.f32 %v985_v1, 0.0 }
 0x1a4   : > { %v1037_v35 = vpop.permute.xlu0 %1036 }
 0x1a5   : > { %2143 = vrsqrt.f32 %v996_v2  ;;  %v997_v4 = vadd.f32 1e-05, %v989_v3 }
 0x1a7   : > { %2145 = vrsqrt.f32 %v997_v4 }
 0x1a8   : > { %v2140_v6 = vpop.eup %2139 }
 0x1a9   : > { %v1002_v7 = vmul.f32 %v2140_v6, %v990_v5 }
 0x1ab   : > { %v1012_v12 = vmul.f32 %v1957_v8, %v1002_v7 }
 0x1ac   : > { %v2142_v10 = vpop.eup %2141 }
 0x1ad   : > { %v1003_v11 = vmul.f32 %v2142_v10, %v991_v9  ;;  %v1022_v18 = vadd.f32 %v1958_v13, %v1012_v12 }
 0x1af   : > { %v1013_v14 = vmul.f32 %v1957_v8, %v1003_v11 }
 0x1b1   : > { %v1023_v19 = vadd.f32 %v1958_v13, %v1013_v14 }
 0x1b2   : > { %v2144_v21 = vpop.eup %2143 }
 0x1b3   : > { %v1026_v23 = vpack.c.bf16 %v1023_v19, %v1022_v18  ;;  %v1004_v24 = vmul.f32 %v2144_v21, %v992_v17 }
 0x1b4   : > { %v2146_v26 = vpop.eup %2145 }
 0x1b5   : > { %2036 = vmatpush3.bf16.msra.mxu0 %v1026_v23  ;;  %v1005_v28 = vmul.f32 %v2146_v26, %v993_v22  ;;  %v1014_v29 = vmul.f32 %v1957_v8, %v1004_v24 }
 0x1b6   : > { %2047 = vmatprep.subr.bf16.mxu0 %v2233_v31 }
 0x1b7   : > { %v1015_v30 = vmul.f32 %v1957_v8, %v1005_v28  ;;  %v1024_v32 = vadd.f32 %v1958_v13, %v1014_v29  ;;  %v1049_v8 = vpop.permute.xlu1 %1048 }
 0x1b8   : > { %2038 = vmatmul.mubr.msk.bf16.vlgmr.msra.gmra.mxu0 %vm1061_vm4, %v2131_v27 }
 0x1b9   : > { %v1025_v33 = vadd.f32 %v1958_v13, %v1015_v30  ;;  %2049 = vmatprep.mubr.msk.bf16.mxu0 %vm2234_vm3, %v2233_v31 }
 0x1bb   : > { %v1027_v34 = vpack.c.bf16 %v1025_v33, %v1024_v32  ;;  %v1054_v13 = vpop.permute.xlu1 %1053 }
 0x1bd   : > { %2048 = vmatpush3.bf16.msra.mxu0 %v1027_v34 }
 0x1c0   : > { %2050 = vmatmul.mubr.msk.bf16.vlgmr.msra.gmra.mxu0 %vm1061_vm4, %v2131_v27 }
 0x278   : > { %v1099_v36 = vpop.f32.mrf.mxu0 }
 0x279   : > { %v1100_v37 = vadd.f32 %v1099_v36, %v1037_v35 }
 0x27a   : > { %v2039_v38 = vpop.f32.mrf.mxu0 }
 0x27b   : > { %v1108_v39 = vmul.f32 0.70710677, %v1100_v37  ;;  %v1106_v56 = vmul.f32 0.5, %v1100_v37 }
 0x27c   : > { %v1102_v41 = vpop.f32.mrf.mxu0 }
 0x27d   : > { %2147 = verf.f32 %v1108_v39  ;;  %v1103_v42 = vadd.f32 %v1102_v41, %v1042_v40  ;;  %v2133_v39 = vld [vmem:[%s2405_s15 + $0x8] sm:$0xff]  }
 0x27e   : > { %v2040_v43 = vpop.f32.mrf.mxu0  ;;  %2059 = vmatprep.subr.bf16.mxu0 %v2133_v39 }
 0x27f   : > { %v1109_v44 = vmul.f32 0.70710677, %v1103_v42  ;;  %v1107_v57 = vmul.f32 0.5, %v1103_v42  ;;  %2060 = vmatpush3.bf16.msra.mxu0 %v2133_v39  ;;  %v2137_v39 = vld [vmem:[%s2419_s21 + $0x8] sm:$0xff]  }
 0x280   : > { %v1200_v45 = vpop.f32.mrf.mxu0 }
 0x281   : > { %2149 = verf.f32 %v1109_v44  ;;  %v1201_v46 = vadd.f32 %v1200_v45, %v1037_v35 }
 0x282   : > { %v2051_v47 = vpop.f32.mrf.mxu0 }
 0x283   : > { %v1209_v48 = vmul.f32 0.70710677, %v1201_v46  ;;  %v1207_v2 = vmul.f32 0.5, %v1201_v46 }
 0x284   : > { %v1203_v49 = vpop.f32.mrf.mxu0 }
 0x285   : > { %2151 = verf.f32 %v1209_v48  ;;  %v1204_v50 = vadd.f32 %v1203_v49, %v1042_v40  ;;  %v2134_v40 = vld [vmem:[%s2405_s15] sm:$0xff]   ;;  %s2715_s15 = sld [smem:[#allocation19_spill]] (!%p1979_p6) }
 0x286   : > { %v2052_v51 = vpop.f32.mrf.mxu0  ;;  %2061 = vmatprep.subr.bf16.mxu0 %v2134_v40 }
 0x287   : > { %v1210_v52 = vmul.f32 0.70710677, %v1204_v50  ;;  %v1208_v3 = vmul.f32 0.5, %v1204_v50  ;;  %2062 = vmatpush3.bf16.msra.mxu0 %v2134_v40  ;;  %v2138_v40 = vld [vmem:[%s2419_s21] sm:$0xff]  }
 0x289   : > { %2153 = verf.f32 %v1210_v52 }
 0x28a   : > { %v2148_v53 = vpop.eup %2147 }
 0x28b   : > { %v1112_v54 = vadd.f32 1.0, %v2148_v53 }
 0x28d   : > { %v1114_v59 = vmul.f32 %v1112_v54, %v1106_v56 }
 0x28e   : > { %v2150_v55 = vpop.eup %2149 }
 0x28f   : > { %v1113_v58 = vadd.f32 1.0, %v2150_v55 }
 0x291   : > { %v1115_v60 = vmul.f32 %v1113_v58, %v1107_v57 }
 0x292   : > { %v2152_v61 = vpop.eup %2151 }
 0x293   : > { %v1116_v62 = vpack.c.bf16 %v1115_v60, %v1114_v59  ;;  %v1213_v0 = vadd.f32 1.0, %v2152_v61 }
 0x295   : > { %2042 = vmatpush3.bf16.msra.mxu1 %v1116_v62  ;;  %v1215_v5 = vmul.f32 %v1213_v0, %v1207_v2 }
 0x296   : > { %v2154_v1 = vpop.eup %2153  ;;  %2053 = vmatprep.subr.bf16.mxu1 %v2233_v31 }
 0x297   : > { %v1214_v4 = vadd.f32 1.0, %v2154_v1 }
 0x298   : > { %2044 = vmatmul.mubr.msk.bf16.vlgmr.msra.gmra.mxu1 %vm1061_vm4, %v2132_v63 }
 0x299   : > { %v1216_v6 = vmul.f32 %v1214_v4, %v1208_v3  ;;  %2055 = vmatprep.mubr.msk.bf16.mxu1 %vm2234_vm3, %v2233_v31 }
 0x29b   : > { %v1217_v7 = vpack.c.bf16 %v1216_v6, %v1215_v5 }
 0x29d   : > { %2054 = vmatpush3.bf16.msra.mxu1 %v1217_v7 }
 0x2a0   : > { %2056 = vmatmul.mubr.msk.bf16.vlgmr.msra.gmra.mxu1 %vm1061_vm4, %v2132_v63 }
 0x358   : > { %v1159_v9 = vpop.f32.mrf.mxu1 }
 0x359   : > { %v1160_v10 = vadd.f32 %v1159_v9, %v1049_v8 }
 0x35a   : > { %v2045_v11 = vpop.f32.mrf.mxu1 }
 0x35b   : > { %v2508_v12 = vadd.f32 %v1160_v10, %v2443_v15  ;;  %v1965_v11 = vld [vmem:[%s2712_s24] ss:$0 sm:$0xff] }
 0x35c   : > { %v1162_v14 = vpop.f32.mrf.mxu1 }
 0x35d   : > { %v1163_v17 = vadd.f32 %v1162_v14, %v1054_v13  ;;  %v1265_v18 = vsel %vm940_vm2, %v2508_v12, 0.0  ;;  %v1281_v31 = vmul.f32 %v2508_v12, %v2508_v12 }
 0x35e   : > { %1266 = vadd.xlane.f32.xlu1 %v1265_v18  ;;  %v2046_v19 = vpop.f32.mrf.mxu1 }
 0x35f   : > { %v2515_v21 = vadd.f32 %v1163_v17, %v2445_v16  ;;  %v1285_v24 = vsel %vm940_vm2, %v1281_v31, 0.0  ;;  %v1966_v31 = vld [vmem:[%s798_s2] ss:$0 sm:$0xff] }
 0x360   : > { %v1252_v22 = vpop.f32.mrf.mxu1 }
 0x361   : > { %v1253_v23 = vadd.f32 %v1252_v22, %v1049_v8  ;;  %v1268_v15 = vsel %vm940_vm2, %v2515_v21, 0.0  ;;  %v1282_v26 = vmul.f32 %v2515_v21, %v2515_v21 }
 0x362   : > { %1286 = vadd.xlane.f32.xlu1 %v1285_v24  ;;  %1269 = vadd.xlane.f32.xlu0 %v1268_v15  ;;  %v2057_v27 = vpop.f32.mrf.mxu1 }
 0x363   : > { %v2523_v28 = vadd.f32 %v1253_v23, %v2453_v20  ;;  %v1288_v30 = vsel %vm940_vm2, %v1282_v26, 0.0 }
 0x364   : > { %v1255_v29 = vpop.f32.mrf.mxu1 }
 0x365   : > { %v1256_v16 = vadd.f32 %v1255_v29, %v1054_v13  ;;  %v1283_v32 = vmul.f32 %v2523_v28, %v2523_v28  ;;  %v1271_v20 = vsel %vm940_vm2, %v2523_v28, 0.0 }
 0x366   : > { %1289 = vadd.xlane.f32.xlu1 %v1288_v30  ;;  %v2058_v33 = vpop.f32.mrf.mxu1 }
 0x367   : > { %v1291_v34 = vsel %vm940_vm2, %v1283_v32, 0.0  ;;  %v2530_v35 = vadd.f32 %v1256_v16, %v2461_v25 }
 0x368   : > { %1292 = vadd.xlane.f32.xlu0 %v1291_v34 }
 0x369   : > { %v1274_v36 = vsel %vm940_vm2, %v2530_v35, 0.0  ;;  %v1284_v37 = vmul.f32 %v2530_v35, %v2530_v35 }
 0x36a   : > { %1272 = vadd.xlane.f32.xlu1 %v1271_v20 }
 0x36b   : > { %v1294_v38 = vsel %vm940_vm2, %v1284_v37, 0.0  ;;  %v2135_v37 = vld [vmem:[%s2419_s21 + $0x18] sm:$0xff]  }
 0x36c   : > { %2067 = vmatprep.subr.bf16.mxu1 %v2135_v37 }
 0x36d   : > { %2068 = vmatpush3.bf16.msra.mxu1 %v2135_v37 }
 0x36e   : > { %1275 = vadd.xlane.f32.xlu1 %v1274_v36 }
 0x372   : > { %1295 = vadd.xlane.f32.xlu1 %v1294_v38  ;;  %v2136_v38 = vld [vmem:[%s2419_s21 + $0x10] sm:$0xff]  }
 0x373   : > { %2069 = vmatprep.subr.bf16.mxu1 %v2136_v38 }
 0x374   : > { %2070 = vmatpush3.bf16.msra.mxu1 %v2136_v38 }
 0x375   : > { %2071 = vmatprep.subr.bf16.mxu1 %v2137_v39 }
 0x378   : > { %2072 = vmatpush3.bf16.msra.mxu1 %v2137_v39 }
 0x379   : > { %2073 = vmatprep.subr.bf16.mxu1 %v2138_v40 }
 0x37c   : > { %2074 = vmatpush3.bf16.msra.mxu1 %v2138_v40 }
 0x3e7   : > { %v1267_v25 = vpop.xlane.xlu1 %1266 }
 0x3e8   : > { %v1277_v41 = vmul.f32 0.03125, %v1267_v25  ;;  %v1967_v25 = vld [vmem:[%s806_s28] ss:$0 sm:$0xff] }
 0x3ea   : > { %v1301_v44 = vmul.f32 %v1277_v41, %v1277_v41  ;;  %v1313_v6 = vsub.f32 %v2508_v12, %v1277_v41 }
 0x3eb   : > { %v1287_v42 = vpop.xlane.xlu1 %1286  ;;  %v1270_v43 = vpop.xlane.xlu0 %1269 }
 0x3ec   : > { %v1297_v45 = vmul.f32 0.03125, %v1287_v42  ;;  %v1278_v46 = vmul.f32 0.03125, %v1270_v43 }
 0x3ee   : > { %v1305_v47 = vsub.f32 %v1297_v45, %v1301_v44  ;;  %v1302_v50 = vmul.f32 %v1278_v46, %v1278_v46  ;;  %v1314_v13 = vsub.f32 %v2515_v21, %v1278_v46 }
 0x3ef   : > { %v1290_v48 = vpop.xlane.xlu1 %1289 }
 0x3f0   : > { %v1309_v49 = vmax.f32 %v1305_v47, 0.0  ;;  %v1298_v51 = vmul.f32 0.03125, %v1290_v48 }
 0x3f1   : > { %v1293_v54 = vpop.xlane.xlu0 %1292 }
 0x3f2   : > { %v1317_v52 = vadd.f32 1e-05, %v1309_v49  ;;  %v1306_v53 = vsub.f32 %v1298_v51, %v1302_v50  ;;  %v1299_v59 = vmul.f32 0.03125, %v1293_v54 }
 0x3f3   : > { %v1273_v55 = vpop.xlane.xlu1 %1272 }
 0x3f4   : > { %2155 = vrsqrt.f32 %v1317_v52  ;;  %v1310_v56 = vmax.f32 %v1306_v53, 0.0  ;;  %v1279_v57 = vmul.f32 0.03125, %v1273_v55 }
 0x3f6   : > { %v1318_v58 = vadd.f32 1e-05, %v1310_v56  ;;  %v1303_v60 = vmul.f32 %v1279_v57, %v1279_v57  ;;  %v1315_v15 = vsub.f32 %v2523_v28, %v1279_v57 }
 0x3f7   : > { %v1276_v61 = vpop.xlane.xlu1 %1275 }
 0x3f8   : > { %2157 = vrsqrt.f32 %v1318_v58  ;;  %v1307_v62 = vsub.f32 %v1299_v59, %v1303_v60  ;;  %v1280_v63 = vmul.f32 0.03125, %v1276_v61 }
 0x3fa   : > { %v1311_v0 = vmax.f32 %v1307_v62, 0.0  ;;  %v1304_v3 = vmul.f32 %v1280_v63, %v1280_v63  ;;  %v1316_v29 = vsub.f32 %v2530_v35, %v1280_v63 }
 0x3fb   : > { %v1296_v1 = vpop.xlane.xlu1 %1295 }
 0x3fc   : > { %v1319_v2 = vadd.f32 1e-05, %v1311_v0  ;;  %v1300_v4 = vmul.f32 0.03125, %v1296_v1 }
 0x3fe   : > { %2159 = vrsqrt.f32 %v1319_v2  ;;  %v1308_v5 = vsub.f32 %v1300_v4, %v1304_v3 }
 0x400   : > { %v1312_v7 = vmax.f32 %v1308_v5, 0.0 }
 0x401   : > { %v2156_v8 = vpop.eup %2155 }
 0x402   : > { %v1320_v9 = vadd.f32 1e-05, %v1312_v7  ;;  %v1325_v10 = vmul.f32 %v2156_v8, %v1313_v6  ;;  %v1972_v7 = vld [vmem:[%s814_s8] ss:$0 sm:$0xff] }
 0x404   : > { %2161 = vrsqrt.f32 %v1320_v9  ;;  %v1335_v18 = vmul.f32 %v1965_v11, %v1325_v10 }
 0x405   : > { %v2158_v14 = vpop.eup %2157 }
 0x406   : > { %v1326_v17 = vmul.f32 %v2158_v14, %v1314_v13  ;;  %v1345_v22 = vadd.f32 %v1966_v31, %v1335_v18 }
 0x408   : > { %v1336_v19 = vmul.f32 %v1965_v11, %v1326_v17 }
 0x40a   : > { %v1346_v23 = vadd.f32 %v1966_v31, %v1336_v19 }
 0x40b   : > { %v2160_v24 = vpop.eup %2159 }
 0x40c   : > { %v1349_v26 = vpack.c.bf16 %v1346_v23, %v1345_v22  ;;  %v1327_v27 = vmul.f32 %v2160_v24, %v1315_v15 }
 0x40e   : > { %2063 = vmatprep.mubr.msk.bf16.mxu0 %vm940_vm2, %v1349_v26  ;;  %v1337_v30 = vmul.f32 %v1965_v11, %v1327_v27 }
 0x410   : > { %v1347_v34 = vadd.f32 %v1966_v31, %v1337_v30 }
 0x411   : > { %v2162_v16 = vpop.eup %2161 }
 0x412   : > { %v1328_v32 = vmul.f32 %v2162_v16, %v1316_v29 }
 0x414   : > { %v1338_v33 = vmul.f32 %v1965_v11, %v1328_v32 }
 0x416   : > { %v1348_v20 = vadd.f32 %v1966_v31, %v1338_v33 }
 0x418   : > { %v1350_v36 = vpack.c.bf16 %v1348_v20, %v1347_v34 }
 0x41a   : > { %2064 = vmatmul.mubr.msk.bf16.vlgmr.msra.gmra.mxu0 %vm940_vm2, %v1350_v36 }
 0x4da   : > { %v2065_v41 = vpop.f32.mrf.mxu0 }
 0x4db   : > { %v1423_v42 = vadd.f32 %v2065_v41, %v1967_v25 }
 0x4dc   : > { %v1414_v43 = vpop.f32.mrf.mxu0 }
 0x4dd   : > { %v1415_v44 = vadd.f32 %v1967_v25, %v1414_v43  ;;  %v1435_v45 = vmul.f32 0.70710677, %v1423_v42  ;;  %v1431_v0 = vmul.f32 0.5, %v1423_v42 }
 0x4de   : > { %v2066_v46 = vpop.f32.mrf.mxu0 }
 0x4df   : > { %v1433_v47 = vmul.f32 0.70710677, %v1415_v44  ;;  %v1426_v48 = vadd.f32 %v2066_v46, %v1967_v25  ;;  %v1429_v61 = vmul.f32 0.5, %v1415_v44 }
 0x4e0   : > { %v1417_v49 = vpop.f32.mrf.mxu0 }
 0x4e1   : > { %2163 = verf.f32 %v1433_v47  ;;  %v1436_v50 = vmul.f32 0.70710677, %v1426_v48  ;;  %v1418_v51 = vadd.f32 %v1967_v25, %v1417_v49  ;;  %v1432_v60 = vmul.f32 0.5, %v1426_v48 }
 0x4e2   : > { %2165 = verf.f32 %v1435_v45 }
 0x4e3   : > { %2167 = verf.f32 %v1436_v50  ;;  %v1434_v52 = vmul.f32 0.70710677, %v1418_v51  ;;  %v1430_v62 = vmul.f32 0.5, %v1418_v51 }
 0x4e5   : > { %2169 = verf.f32 %v1434_v52 }
 0x4ee   : > { %v2164_v53 = vpop.eup %2163 }
 0x4ef   : > { %v2166_v54 = vpop.eup %2165  ;;  %v1441_v56 = vadd.f32 1.0, %v2164_v53 }
 0x4f0   : > { %v2168_v55 = vpop.eup %2167  ;;  %v1443_v59 = vadd.f32 1.0, %v2166_v54 }
 0x4f1   : > { %v1444_v57 = vadd.f32 1.0, %v2168_v55  ;;  %v1445_v2 = vmul.f32 %v1441_v56, %v1429_v61 }
 0x4f2   : > { %v2170_v58 = vpop.eup %2169  ;;  %v1447_v4 = vmul.f32 %v1443_v59, %v1431_v0 }
 0x4f3   : > { %v1442_v63 = vadd.f32 1.0, %v2170_v58  ;;  %v1448_v1 = vmul.f32 %v1444_v57, %v1432_v60 }
 0x4f5   : > { %v1446_v3 = vmul.f32 %v1442_v63, %v1430_v62  ;;  %v1450_v6 = vpack.c.bf16 %v1448_v1, %v1447_v4 }
 0x4f7   : > { %v1449_v5 = vpack.c.bf16 %v1446_v3, %v1445_v2 }
 0x4f9   : > { %2075 = vmatprep.mubr.msk.bf16.mxu1 %vm1490_vm5, %v1449_v5 }
 0x4fa   : > { %2076 = vmatmul.mubr.msk.bf16.vlgmr.msra.gmra.mxu1 %vm1490_vm5, %v1450_v6 }
 0x5ba   : > { %v2077_v8 = vpop.f32.mrf.mxu1 }
 0x5bb   : > { %v1540_v9 = vadd.f32 %v2077_v8, %v1972_v7 }
 0x5bc   : > { %v1531_v10 = vpop.f32.mrf.mxu1 }
 0x5bd   : > { %v2572_v11 = vadd.f32 %v1540_v9, %v2523_v28  ;;  %v1532_v13 = vadd.f32 %v1972_v7, %v1531_v10 }
 0x5be   : > { %v2078_v14 = vpop.f32.mrf.mxu1 }
 0x5bf   : > { %1552 = vst.msk [vmem:[#allocation2 + $0x10] sm:$0xff] %vm940_vm2, %v2572_v11  ;;  %v2577_v17 = vadd.f32 %v1532_v13, %v2508_v12  ;;  %v1543_v18 = vadd.f32 %v2078_v14, %v1972_v7 }
 0x5c0   : > { %v1534_v31 = vpop.f32.mrf.mxu1 }
 0x5c1   : > { %1550 = vst.msk [vmem:[#allocation2] sm:$0xff] %vm940_vm2, %v2577_v17  ;;  %v2582_v19 = vadd.f32 %v1543_v18, %v2530_v35  ;;  %v1535_v22 = vadd.f32 %v1972_v7, %v1534_v31  ;;  %1557 = sbr.rel (%p1979_p6) target bundleno = 1881 (0x759), region = 104 }
 0x5c3   : > { %1553 = vst.msk [vmem:[#allocation2 + $0x18] sm:$0xff] %vm940_vm2, %v2582_v19  ;;  %v2587_v28 = vadd.f32 %v1535_v22, %v2515_v21 }
 0x5c5   : > { %1551 = vst.msk [vmem:[#allocation2 + $0x8] sm:$0xff] %vm940_vm2, %v2587_v28 }
 0x5c6   : > { %v1566_v12 = vsel %vm940_vm2, %v2572_v11, 0.0  ;;  %v1560_v35 = vsel %vm940_vm2, %v2577_v17, 0.0  ;;  %v1569_v23 = vsel %vm940_vm2, %v2582_v19, 0.0  ;;  %v1563_v21 = vsel %vm940_vm2, %v2587_v28, 0.0  ;;  %v2171_v33 = vld [vmem:[%s2679_s17 + $0x8] sm:$0xff]   ;;  %v2172_v20 = vld [vmem:[%s2679_s17] sm:$0xff]  }
 0x5c7   : > { %1567 = vadd.xlane.f32.xlu1 %v1566_v12  ;;  %1561 = vadd.xlane.f32.xlu0 %v1560_v35  ;;  %v1577_v24 = vmul.f32 %v2587_v28, %v2587_v28  ;;  %v1576_v15 = vmul.f32 %v2577_v17, %v2577_v17  ;;  %v1579_v29 = vmul.f32 %v2582_v19, %v2582_v19  ;;  %v2236_v34 = vmov 0.0   ;;  %v1980_v6 = vld [vmem:[%s2713_s26] ss:$0 sm:$0xff] }
 0x5c8   : > { %v1578_v16 = vmul.f32 %v2572_v11, %v2572_v11  ;;  %2079 = vmatprep.subr.bf16.mxu0 %v2236_v34  ;;  %vm2237_vm6 = vmmov 0   ;;  %v1981_v10 = vld [vmem:[%s2714_s25] ss:$0 sm:$0xff]  ;;  %vm1682_vm7 = vcmask 1041409   ;;  %vm1740_vm8 = vcmask 58368  }
 0x5c9   : > { %v1583_v26 = vsel %vm940_vm2, %v1577_v24, 0.0  ;;  %v1580_v27 = vsel %vm940_vm2, %v1576_v15, 0.0  ;;  %v1589_v30 = vsel %vm940_vm2, %v1579_v29, 0.0  ;;  %2083 = vmatprep.mubr.msk.bf16.mxu0 %vm2237_vm6, %v2236_v34  ;;  %2080 = vmatpush3.bf16.msra.mxu0 %v2171_v33 }
 0x5ca   : > { %v1586_v32 = vsel %vm940_vm2, %v1578_v16, 0.0  ;;  %2081 = vmatprep.subr.bf16.mxu0 %v2236_v34 }
 0x5cb   : > { %1570 = vadd.xlane.f32.xlu1 %v1569_v23  ;;  %1564 = vadd.xlane.f32.xlu0 %v1563_v21 }
 0x5cd   : > { %2082 = vmatpush3.bf16.msra.mxu0 %v2172_v20 }
 0x5cf   : > { %1584 = vadd.xlane.f32.xlu1 %v1583_v26  ;;  %1581 = vadd.xlane.f32.xlu0 %v1580_v27 }
 0x5d3   : > { %1590 = vadd.xlane.f32.xlu1 %v1589_v30  ;;  %1587 = vadd.xlane.f32.xlu0 %v1586_v32 }
 0x650   : > { %v1568_v36 = vpop.xlane.xlu1 %1567  ;;  %v1562_v37 = vpop.xlane.xlu0 %1561 }
 0x651   : > { %v1572_v40 = vmul.f32 0.03125, %v1562_v37  ;;  %v1574_v41 = vmul.f32 0.03125, %v1568_v36 }
 0x653   : > { %v1596_v45 = vmul.f32 %v1572_v40, %v1572_v40  ;;  %v1598_v51 = vmul.f32 %v1574_v41, %v1574_v41  ;;  %v1608_v5 = vsub.f32 %v2577_v17, %v1572_v40  ;;  %v1610_v31 = vsub.f32 %v2572_v11, %v1574_v41 }
 0x654   : > { %v1571_v38 = vpop.xlane.xlu1 %1570  ;;  %v1565_v39 = vpop.xlane.xlu0 %1564 }
 0x655   : > { %v1573_v25 = vmul.f32 0.03125, %v1565_v39  ;;  %v1575_v42 = vmul.f32 0.03125, %v1571_v38 }
 0x657   : > { %v1597_v46 = vmul.f32 %v1573_v25, %v1573_v25  ;;  %v1599_v52 = vmul.f32 %v1575_v42, %v1575_v42  ;;  %v1609_v3 = vsub.f32 %v2587_v28, %v1573_v25  ;;  %v1611_v13 = vsub.f32 %v2582_v19, %v1575_v42 }
 0x658   : > { %v1585_v43 = vpop.xlane.xlu1 %1584  ;;  %v1582_v44 = vpop.xlane.xlu0 %1581 }
 0x659   : > { %v1593_v47 = vmul.f32 0.03125, %v1585_v43  ;;  %v1592_v48 = vmul.f32 0.03125, %v1582_v44 }
 0x65b   : > { %v1601_v49 = vsub.f32 %v1593_v47, %v1597_v46  ;;  %v1600_v50 = vsub.f32 %v1592_v48, %v1596_v45 }
 0x65c   : > { %v1591_v53 = vpop.xlane.xlu1 %1590  ;;  %v1588_v54 = vpop.xlane.xlu0 %1587 }
 0x65d   : > { %v1605_v55 = vmax.f32 %v1601_v49, 0.0  ;;  %v1604_v56 = vmax.f32 %v1600_v50, 0.0  ;;  %v1595_v57 = vmul.f32 0.03125, %v1591_v53  ;;  %v1594_v58 = vmul.f32 0.03125, %v1588_v54 }
 0x65f   : > { %v1613_v59 = vadd.f32 1e-05, %v1605_v55  ;;  %v1612_v60 = vadd.f32 1e-05, %v1604_v56  ;;  %v1603_v61 = vsub.f32 %v1595_v57, %v1599_v52  ;;  %v1602_v62 = vsub.f32 %v1594_v58, %v1598_v51  ;;  %v1982_v51 = vld [vmem:[%s2715_s15] ss:$0 sm:$0xff] }
 0x661   : > { %2173 = vrsqrt.f32 %v1613_v59  ;;  %v1607_v63 = vmax.f32 %v1603_v61, 0.0  ;;  %v1606_v0 = vmax.f32 %v1602_v62, 0.0 }
 0x662   : > { %2175 = vrsqrt.f32 %v1612_v60 }
 0x663   : > { %v1615_v1 = vadd.f32 1e-05, %v1607_v63  ;;  %v1614_v2 = vadd.f32 1e-05, %v1606_v0 }
 0x665   : > { %2177 = vrsqrt.f32 %v1615_v1 }
 0x666   : > { %2179 = vrsqrt.f32 %v1614_v2 }
 0x66e   : > { %v2174_v4 = vpop.eup %2173 }
 0x66f   : > { %v2176_v7 = vpop.eup %2175  ;;  %v1621_v8 = vmul.f32 %v2174_v4, %v1609_v3 }
 0x670   : > { %v1620_v9 = vmul.f32 %v2176_v7, %v1608_v5 }
 0x671   : > { %v1631_v14 = vmul.f32 %v1980_v6, %v1621_v8 }
 0x672   : > { %v2178_v18 = vpop.eup %2177  ;;  %v1630_v22 = vmul.f32 %v1980_v6, %v1620_v9 }
 0x673   : > { %v2180_v28 = vpop.eup %2179  ;;  %v1623_v17 = vmul.f32 %v2178_v18, %v1611_v13  ;;  %v1641_v12 = vadd.f32 %v1981_v10, %v1631_v14 }
 0x674   : > { %v1622_v35 = vmul.f32 %v2180_v28, %v1610_v31  ;;  %v1640_v23 = vadd.f32 %v1981_v10, %v1630_v22 }
 0x675   : > { %v1633_v21 = vmul.f32 %v1980_v6, %v1623_v17  ;;  %v1645_v24 = vsel %vm940_vm2, %v1641_v12, 0.0 }
 0x676   : > { %v1632_v15 = vmul.f32 %v1980_v6, %v1622_v35  ;;  %v1644_v26 = vsel %vm940_vm2, %v1640_v23, 0.0 }
 0x677   : > { %v1643_v27 = vadd.f32 %v1981_v10, %v1633_v21  ;;  %v1646_v29 = vadd.f32 %v1645_v24, %v1644_v26 }
 0x678   : > { %v1642_v16 = vadd.f32 %v1981_v10, %v1632_v15 }
 0x679   : > { %v1647_v19 = vrot.slane %v1646_v29, 4  ;;  %v1654_v30 = vsel %vm940_vm2, %v1643_v27, 0.0 }
 0x67a   : > { %v1653_v11 = vsel %vm940_vm2, %v1642_v16, 0.0 }
 0x67b   : > { %v1648_v32 = vadd.f32 %v1647_v19, %v1646_v29  ;;  %v1655_v33 = vadd.f32 %v1654_v30, %v1653_v11 }
 0x67d   : > { %v1649_v34 = vrot.slane %v1648_v32, 2  ;;  %v1656_v20 = vrot.slane %v1655_v33, 4 }
 0x67f   : > { %v1650_v36 = vadd.f32 %v1649_v34, %v1648_v32  ;;  %v1657_v37 = vadd.f32 %v1656_v20, %v1655_v33 }
 0x681   : > { %v1651_v38 = vrot.slane %v1650_v36, 1  ;;  %v1658_v39 = vrot.slane %v1657_v37, 2 }
 0x683   : > { %v1652_v40 = vadd.f32 %v1651_v38, %v1650_v36  ;;  %v1659_v25 = vadd.f32 %v1658_v39, %v1657_v37 }
 0x685   : > { %v1660_v41 = vrot.slane %v1659_v25, 1  ;;  %v1663_v42 = vmul.f32 0.0625, %v1652_v40 }
 0x687   : > { %v1661_v43 = vadd.f32 %v1660_v41, %v1659_v25  ;;  %v1665_v45 = vpack.c.bf16 %v1663_v42, %v1663_v42 }
 0x689   : > { %v1664_v44 = vmul.f32 0.0625, %v1661_v43  ;;  %v1680_v47 = vunpack.c.l.b16 %v1665_v45 }
 0x68b   : > { %v1666_v46 = vpack.c.bf16 %v1664_v44, %v1664_v44 }
 0x68d   : > { %v1681_v48 = vunpack.c.l.b16 %v1666_v46 }
 0x68f   : > { %v1683_v49 = vsel %vm1682_vm7, %v1681_v48, %v1680_v47 }
 0x690   : > { %v1684_v50 = vpack.c.b16 %v1683_v49, %v1683_v49 }
 0x692   : > { %2084 = vmatmul.mubr.msk.bf16.vlgmr.msra.gmra.mxu0 %vm940_vm2, %v1684_v50 }
 0x752   : > { %v1734_v52 = vpop.f32.mrf.mxu0 }
 0x753   : > { %v1735_v53 = vadd.f32 %v1982_v51, %v1734_v52 }
 0x754   : > { %v2085_v54 = vpop.f32.mrf.mxu0 }
 0x755   : > { %1741 = vst.msk [vmem:[#allocation3] sm:$0x3] %vm1740_vm8, %v1735_v53 }
 0x756   : > { %v1737_v55 = vpop.f32.mrf.mxu0 }
 0x758   : > { %v2086_v56 = vpop.f32.mrf.mxu0 }
 0x759 PF: > { %s2716_s30 = sld [smem:[#allocation7_spill]]  ;;  %s2238_s6 = smov [#allocation3]  }
 0x75a   : > { %s1751_s2 = sshll.u32 %s2238_s6, 4  ;;  %s1752_s2 = int_to_ptr.vmem [resolvable:$true] %s1751_s2 }
 0x75b   : > { %s2181_s1 = scalar_lea.vmem %s1752_s2, 32  ;;  %p2188_p11 = scmp.lt.s32.totalorder %s1752_s2, %s1752_s2 }
 0x75c   : > { %p2182_p8 = scmp.ne.s32.totalorder %s1752_s2, %s2181_s1  ;;  %p2189_p12 = scmp.lt.s32.totalorder %s2181_s1, %s2181_s1 }
 0x75e   : > { %p2190_p13 = por %p2189_p12, %p2188_p11 }
 0x75f   : > { %s2717_s24 = sadd.s32 4294967295, %s2716_s30  }
 0x760   : > { %p2638_p7 = scmp.eq.s32.totalorder %s2717_s24, 1 }
 0x762   : > { %p2183_p9 = pnand %p2182_p8, %p2638_p7 }
 0x764   : > { %p2184_p10 = pneg %p2183_p9 }
 0x766   : > { %p2191_p0 = pnand %p2190_p13, %p2184_p10 }
 0x768   : > { %2194 = shalt.err (!%p2191_p0)
}
 0x769   : > { %s2719_s8 = sld [smem:[#allocation20_spill]] }
 0x76f   : > { %2088 = dma.vmem_to_hbm [thread:$0]  (%p2638_p7), %s1752_s2, 32, %s2719_s8, [#allocation4]  }
 0x770   : > { %2218 = dma.done.wait (%p2638_p7), [#allocation4], 32  }
 0x771   : > { %2220 = vsyncadd (%p2638_p7), [#allocation4], 4294967264 }
 0x772 PF: > { %s2720_s0 = sld [smem:[#allocation7_spill]] }
 0x773   : > { %s2722_s30 = sld [smem:[#allocation8_spill]] }
 0x778   : > { %s30_s20 = sadd.s32 1, %s2720_s0   ;;  %s2721_s0 = sld [smem:[#allocation6_spill]] }
 0x779   : > { %p27_p1 = scmp.ge.s32.totalorder %s30_s20, 4  }
 0x77b   :  { %29 = sbr.rel (!%p27_p1) target bundleno = 15 (0xf), region = 168 }
 0x780   :  { %1764 = vsyncpa [#allocation4], 1 }
 0x781   :  { %1766 = vsyncpa [#allocation4 + $0x1], 1 }

</bundles_post_ra>
